<compile_context>
chip_gen: v6e
topology: v6e:2x2x1
jax: 0.10.0
libtpu: 0.0.40
codegen_flags: <defaults>
</compile_context>

<pallas_src>
import functools
import math

import numpy as np
import jax
import jax.numpy as jnp
from jax.experimental import pallas as pl
from jax.experimental.pallas import tpu as pltpu


# ----------------------------------------------------------------------------
# Positional encoding (host-side, matches the reference numpy implementation)
# ----------------------------------------------------------------------------
def positional_encoding(D, position=120):
    pos = np.arange(position)[:, np.newaxis]
    i = np.arange(D)[np.newaxis, :]
    angle_rates = 1.0 / np.power(10000, 2 * (i // 2) / np.float32(D))
    angle_rads = pos * angle_rates
    angle_rads[:, 0::2] = np.sin(angle_rads[:, 0::2])
    angle_rads[:, 1::2] = np.cos(angle_rads[:, 1::2])
    return jnp.asarray(angle_rads[np.newaxis, ...], dtype=jnp.float32)  # (1, position, D)


# ----------------------------------------------------------------------------
# Fused whole-forward kernel (one grid step == one batch element)
# ----------------------------------------------------------------------------
def fused_transformer_kernel(
    x_ref, negmask_ref, pe_ref,
    wi_ref, bi_ref,                 # input projection (sqrt(D) pre-folded)
    wqkv_ref, bqkv_ref,             # fused qkv:   (L, D, 3*DH), (L, 1, 3*DH)
    wo_ref, bo_ref,                 # attn dense:  (L, DH, D),   (L, 1, D)
    g1_ref, beta1_ref,              # layernorm1:  (L, 1, D)
    wh_ref, bh_ref,                 # mlp hidden:  (L, D, M),    (L, 1, M)
    wm_ref, bm_ref,                 # mlp out:     (L, M, D),    (L, 1, D)
    g2_ref, beta2_ref,              # layernorm2:  (L, 1, D)
    wout_ref, bout_ref,             # output projection
    out_ref, attw_ref,
    *, num_layers, H, Dh, compute_dtype,
):
    DH = H * Dh
    f32 = jnp.float32

    def mm(a, b):
        # MXU matmul; operands optionally cast (bf16 on v6e/v7x), f32 accumulate.
        return jnp.dot(a.astype(compute_dtype), b.astype(compute_dtype),
                       preferred_element_type=f32)

    def layernorm(y, gamma, beta):
        # Biased variance, eps=1e-9 (matches nn.LayerNorm); rsqrt -> EUP.
        mu = jnp.mean(y, axis=-1, keepdims=True)
        var = jnp.mean((y - mu) ** 2, axis=-1, keepdims=True)
        return (y - mu) * jax.lax.rsqrt(var + 1e-9) * gamma + beta

    x = x_ref[0]                       # (S, F)
    neg_mask = negmask_ref[...]        # (S, S), already scaled by -1e9

    # Input projection (+ sqrt(D) folded into wi/bi) + positional encoding.
    h = mm(x, wi_ref[...]) + bi_ref[...] + pe_ref[...]          # (S, D)

    inv_sqrt_d = 1.0 / math.sqrt(Dh)

    for l in range(num_layers):        # static unroll over layers
        # Fused Q|K|V projection: one MXU pass with 3*DH output columns.
        qkv = mm(h, wqkv_ref[l]) + bqkv_ref[l]                  # (S, 3*DH)
        q = qkv[:, 0:DH]
        k = qkv[:, DH:2 * DH]
        v = qkv[:, 2 * DH:3 * DH]

        # Per-head attention (H small & static; head-batched dot_general only
        # pays off once Dh approaches 128).
        head_ws = []
        head_outs = []
        for hh in range(H):
            qh = q[:, hh * Dh:(hh + 1) * Dh]
            kh = k[:, hh * Dh:(hh + 1) * Dh]
            vh = v[:, hh * Dh:(hh + 1) * Dh]
            scores = mm(qh, kh.T) * inv_sqrt_d + neg_mask       # (S, S)
            scores = scores - jnp.max(scores, axis=-1, keepdims=True)
            e = jnp.exp(scores)
            w = e * pl.reciprocal(jnp.sum(e, axis=-1, keepdims=True), approx=False)
            head_ws.append(w)
            head_outs.append(mm(w, vh))                         # (S, Dh)

        # Single lane-packed store of the attention weights for this layer.
        attw_ref[l, 0] = jnp.concatenate(head_ws, axis=-1)      # (S, H*S)

        concat = jnp.concatenate(head_outs, axis=-1)            # (S, H*Dh)
        attn = mm(concat, wo_ref[l]) + bo_ref[l]                # (S, D)

        n1 = layernorm(attn + h, g1_ref[l], beta1_ref[l])

        hid = jnp.maximum(mm(n1, wh_ref[l]) + bh_ref[l], 0.0)   # (S, M)
        mlp = mm(hid, wm_ref[l]) + bm_ref[l]                    # (S, D)

        h = layernorm(mlp + n1, g2_ref[l], beta2_ref[l])

    out_ref[0] = mm(h, wout_ref[...]) + bout_ref[...]


# ----------------------------------------------------------------------------
# Wrapper: host-side weight packing + single pallas_call
# ----------------------------------------------------------------------------
def _rep(shape):
    # Whole-array block, replicated across the batch grid.
    return pl.BlockSpec(shape, lambda b, _s=shape: (0,) * len(_s))


def transformer_forward(params, x, mask, *, D, H, pos_encoding,
                        compute_dtype=jnp.float32):
    B, S, F = x.shape
    L = len(params["layers"])
    DH = D * H
    M = params["layers"][0]["wh"].shape[1]
    O = params["out_w"].shape[1]
    sqrt_D = math.sqrt(D)

    # Host-side prep: fold sqrt(D), pre-scale the mask, fuse Q|K|V, stack layers.
    wi = params["inp_w"] * sqrt_D
    bi = params["inp_b"] * sqrt_D
    pe = pos_encoding[0, :S, :]                                  # (S, D)
    neg_mask = mask * (-1e9)

    def stack(fn):
        return jnp.stack([fn(lp) for lp in params["layers"]], axis=0)

    wqkv = stack(lambda lp: jnp.concatenate([lp["wq"], lp["wk"], lp["wv"]], axis=1))
    bqkv = stack(lambda lp: jnp.concatenate([lp["bq"], lp["bk"], lp["bv"]], axis=1))
    wo = stack(lambda lp: lp["wo"])
    bo = stack(lambda lp: lp["bo"])
    g1 = stack(lambda lp: lp["g1"])
    beta1 = stack(lambda lp: lp["beta1"])
    wh = stack(lambda lp: lp["wh"])
    bh = stack(lambda lp: lp["bh"])
    wm = stack(lambda lp: lp["wm"])
    bm = stack(lambda lp: lp["bm"])
    g2 = stack(lambda lp: lp["g2"])
    beta2 = stack(lambda lp: lp["beta2"])

    kernel = functools.partial(
        fused_transformer_kernel,
        num_layers=L, H=H, Dh=D, compute_dtype=compute_dtype)

    in_specs = [
        pl.BlockSpec((1, S, F), lambda b: (b, 0, 0)),            # x
        _rep((S, S)),                                            # neg_mask
        _rep((S, D)),                                            # pe
        _rep((F, D)), _rep((1, D)),                              # wi, bi
        _rep((L, D, 3 * DH)), _rep((L, 1, 3 * DH)),              # wqkv, bqkv
        _rep((L, DH, D)), _rep((L, 1, D)),                       # wo, bo
        _rep((L, 1, D)), _rep((L, 1, D)),                        # g1, beta1
        _rep((L, D, M)), _rep((L, 1, M)),                        # wh, bh
        _rep((L, M, D)), _rep((L, 1, D)),                        # wm, bm
        _rep((L, 1, D)), _rep((L, 1, D)),                        # g2, beta2
        _rep((D, O)), _rep((1, O)),                              # wout, bout
    ]

    out, attw_packed = pl.pallas_call(
        kernel,
        out_shape=(
            jax.ShapeDtypeStruct((B, S, O), jnp.float32),
            jax.ShapeDtypeStruct((L, B, S, H * S), jnp.float32),
        ),
        grid=(B,),
        in_specs=in_specs,
        out_specs=(
            pl.BlockSpec((1, S, O), lambda b: (b, 0, 0)),
            pl.BlockSpec((L, 1, S, H * S), lambda b: (0, b, 0, 0)),
        ),
        compiler_params=pltpu.CompilerParams(
            dimension_semantics=("parallel",)),                  # 2 TCs on v7x
    )(x, neg_mask, pe, wi, bi, wqkv, bqkv, wo, bo,
      g1, beta1, wh, bh, wm, bm, g2, beta2,
      params["out_w"], params["out_b"])

    # Unpack attention weights back to the reference (B, H, S, S) per layer.
    attention_weights = {}
    for i in range(L):
        aw = attw_packed[i].reshape(B, S, H, S).transpose(0, 2, 1, 3)
        attention_weights["decoder_layer{}".format(i + 1)] = aw
    return out, attention_weights


# ----------------------------------------------------------------------------
# Parameter construction (deterministic, PyTorch-Linear-style uniform init)
# ----------------------------------------------------------------------------
def init_linear(key, fan_in, fan_out):
    kw, kb = jax.random.split(key)
    bound = 1.0 / math.sqrt(fan_in)
    w = jax.random.uniform(kw, (fan_in, fan_out), jnp.float32, -bound, bound)
    b = jax.random.uniform(kb, (1, fan_out), jnp.float32, -bound, bound)
    return w, b


def init_transformer_params(key, num_layers, D, H, hidden_mlp_dim, inp_features, out_features):
    keys = jax.random.split(key, 2 + num_layers)
    params = {}
    params["inp_w"], params["inp_b"] = init_linear(keys[0], inp_features, D)
    params["out_w"], params["out_b"] = init_linear(keys[1], D, out_features)
    params["layers"] = []
    DH = D * H
    for li in range(num_layers):
        lk = jax.random.split(keys[2 + li], 6)
        lp = {}
        lp["wq"], lp["bq"] = init_linear(lk[0], D, DH)
        lp["wk"], lp["bk"] = init_linear(lk[1], D, DH)
        lp["wv"], lp["bv"] = init_linear(lk[2], D, DH)
        lp["wo"], lp["bo"] = init_linear(lk[3], DH, D)
        lp["wh"], lp["bh"] = init_linear(lk[4], D, hidden_mlp_dim)
        lp["wm"], lp["bm"] = init_linear(lk[5], hidden_mlp_dim, D)
        lp["g1"] = jnp.ones((1, D), jnp.float32)
        lp["beta1"] = jnp.zeros((1, D), jnp.float32)
        lp["g2"] = jnp.ones((1, D), jnp.float32)
        lp["beta2"] = jnp.zeros((1, D), jnp.float32)
        params["layers"].append(lp)
    return params


# ----------------------------------------------------------------------------
# Main
# ----------------------------------------------------------------------------
if __name__ == "__main__":
    # Small shapes consistent with the module.
    B, S = 2, 8
    num_layers, D, H = 2, 32, 2
    hidden_mlp_dim, inp_features, out_features = 64, 16, 8

    key = jax.random.PRNGKey(0)
    kx, kp = jax.random.split(key)
    x = jax.random.normal(kx, (B, S, inp_features), dtype=jnp.float32)

    # Causal look-ahead mask: 1 above the diagonal (positions to be masked).
    mask = jnp.triu(jnp.ones((S, S), jnp.float32), k=1)

    params = init_transformer_params(
        kp, num_layers, D, H, hidden_mlp_dim, inp_features, out_features
    )
    pe = positional_encoding(D)

    # compute_dtype=jnp.bfloat16 is recommended at production scale on v6e/v7x;
    # float32 keeps exact reference numerics for this check.
    out, attn_weights = transformer_forward(
        params, x, mask, D=D, H=H, pos_encoding=pe, compute_dtype=jnp.float32
    )
    jax.block_until_ready(out)
    for v in attn_weights.values():
        jax.block_until_ready(v)

    assert out.shape == (B, S, out_features)
    assert attn_weights["decoder_layer1"].shape == (B, H, S, S)
    assert attn_weights["decoder_layer2"].shape == (B, H, S, S)
    print("KERNEL_OK")
</pallas_src>

<mosaic_0001>
module attributes {stable_mosaic.version = 11 : i64} {
  func.func @fused_transformer_kernel(%arg0: i32, %arg1: memref<1x8x16xf32, #tpu.memory_space<vmem>>, %arg2: memref<8x8xf32, #tpu.memory_space<vmem>>, %arg3: memref<8x32xf32, #tpu.memory_space<vmem>>, %arg4: memref<16x32xf32, #tpu.memory_space<vmem>>, %arg5: memref<1x32xf32, #tpu.memory_space<vmem>>, %arg6: memref<2x32x192xf32, #tpu.memory_space<vmem>>, %arg7: memref<2x1x192xf32, #tpu.memory_space<vmem>>, %arg8: memref<2x64x32xf32, #tpu.memory_space<vmem>>, %arg9: memref<2x1x32xf32, #tpu.memory_space<vmem>>, %arg10: memref<2x1x32xf32, #tpu.memory_space<vmem>>, %arg11: memref<2x1x32xf32, #tpu.memory_space<vmem>>, %arg12: memref<2x32x64xf32, #tpu.memory_space<vmem>>, %arg13: memref<2x1x64xf32, #tpu.memory_space<vmem>>, %arg14: memref<2x64x32xf32, #tpu.memory_space<vmem>>, %arg15: memref<2x1x32xf32, #tpu.memory_space<vmem>>, %arg16: memref<2x1x32xf32, #tpu.memory_space<vmem>>, %arg17: memref<2x1x32xf32, #tpu.memory_space<vmem>>, %arg18: memref<32x8xf32, #tpu.memory_space<vmem>>, %arg19: memref<1x8xf32, #tpu.memory_space<vmem>>, %arg20: memref<1x8x8xf32, #tpu.memory_space<vmem>>, %arg21: memref<2x1x8x16xf32, #tpu.memory_space<vmem>>) attributes {dimension_semantics = [#tpu.dimension_semantics<parallel>], iteration_bounds = array<i64: 2>, scalar_prefetch = 0 : i64, scratch_operands = 0 : i64, tpu.core_type = #tpu.core_type<tc>, window_params = [{transform_indices = @transform_0, window_bounds = array<i64: 1, 8, 16>}, {pipeline_mode = #tpu.pipeline_mode<synchronous>, transform_indices = @transform_1, window_bounds = array<i64: 8, 8>}, {pipeline_mode = #tpu.pipeline_mode<synchronous>, transform_indices = @transform_2, window_bounds = array<i64: 8, 32>}, {pipeline_mode = #tpu.pipeline_mode<synchronous>, transform_indices = @transform_3, window_bounds = array<i64: 16, 32>}, {pipeline_mode = #tpu.pipeline_mode<synchronous>, transform_indices = @transform_4, window_bounds = array<i64: 1, 32>}, {pipeline_mode = #tpu.pipeline_mode<synchronous>, transform_indices = @transform_5, window_bounds = array<i64: 2, 32, 192>}, {pipeline_mode = #tpu.pipeline_mode<synchronous>, transform_indices = @transform_6, window_bounds = array<i64: 2, 1, 192>}, {pipeline_mode = #tpu.pipeline_mode<synchronous>, transform_indices = @transform_7, window_bounds = array<i64: 2, 64, 32>}, {pipeline_mode = #tpu.pipeline_mode<synchronous>, transform_indices = @transform_8, window_bounds = array<i64: 2, 1, 32>}, {pipeline_mode = #tpu.pipeline_mode<synchronous>, transform_indices = @transform_9, window_bounds = array<i64: 2, 1, 32>}, {pipeline_mode = #tpu.pipeline_mode<synchronous>, transform_indices = @transform_10, window_bounds = array<i64: 2, 1, 32>}, {pipeline_mode = #tpu.pipeline_mode<synchronous>, transform_indices = @transform_11, window_bounds = array<i64: 2, 32, 64>}, {pipeline_mode = #tpu.pipeline_mode<synchronous>, transform_indices = @transform_12, window_bounds = array<i64: 2, 1, 64>}, {pipeline_mode = #tpu.pipeline_mode<synchronous>, transform_indices = @transform_13, window_bounds = array<i64: 2, 64, 32>}, {pipeline_mode = #tpu.pipeline_mode<synchronous>, transform_indices = @transform_14, window_bounds = array<i64: 2, 1, 32>}, {pipeline_mode = #tpu.pipeline_mode<synchronous>, transform_indices = @transform_15, window_bounds = array<i64: 2, 1, 32>}, {pipeline_mode = #tpu.pipeline_mode<synchronous>, transform_indices = @transform_16, window_bounds = array<i64: 2, 1, 32>}, {pipeline_mode = #tpu.pipeline_mode<synchronous>, transform_indices = @transform_17, window_bounds = array<i64: 32, 8>}, {pipeline_mode = #tpu.pipeline_mode<synchronous>, transform_indices = @transform_18, window_bounds = array<i64: 1, 8>}, {transform_indices = @transform_19, window_bounds = array<i64: 1, 8, 8>}, {transform_indices = @transform_20, window_bounds = array<i64: 2, 1, 8, 16>}]} {
    %c0 = arith.constant 0 : index
    %c0_0 = arith.constant 0 : index
    %c0_1 = arith.constant 0 : index
    %0 = vector.load %arg1[%c0, %c0_0, %c0_1] : memref<1x8x16xf32, #tpu.memory_space<vmem>>, vector<1x8x16xf32>
    %1 = vector.shape_cast %0 : vector<1x8x16xf32> to vector<8x16xf32>
    %c0_2 = arith.constant 0 : index
    %c0_3 = arith.constant 0 : index
    %2 = vector.load %arg2[%c0_2, %c0_3] : memref<8x8xf32, #tpu.memory_space<vmem>>, vector<8x8xf32>
    %c0_4 = arith.constant 0 : index
    %c0_5 = arith.constant 0 : index
    %3 = vector.load %arg4[%c0_4, %c0_5] : memref<16x32xf32, #tpu.memory_space<vmem>>, vector<16x32xf32>
    %cst = arith.constant dense<0.000000e+00> : vector<8x32xf32>
    %4 = tpu.matmul %1, %3, %cst {dimension_numbers = #tpu.dot_dimension_numbers<[1], [0], [0], [1], [0, 0, 1, 1], [], []>} : vector<8x16xf32>, vector<16x32xf32>, vector<8x32xf32> -> vector<8x32xf32>
    %c0_6 = arith.constant 0 : index
    %c0_7 = arith.constant 0 : index
    %5 = vector.load %arg5[%c0_6, %c0_7] : memref<1x32xf32, #tpu.memory_space<vmem>>, vector<1x32xf32>
    %6 = vector.broadcast %5 : vector<1x32xf32> to vector<8x32xf32>
    %7 = arith.addf %4, %6 : vector<8x32xf32>
    %c0_8 = arith.constant 0 : index
    %c0_9 = arith.constant 0 : index
    %8 = vector.load %arg3[%c0_8, %c0_9] : memref<8x32xf32, #tpu.memory_space<vmem>>, vector<8x32xf32>
    %9 = arith.addf %7, %8 : vector<8x32xf32>
    %c0_10 = arith.constant 0 : index
    %c0_11 = arith.constant 0 : index
    %c0_12 = arith.constant 0 : index
    %10 = vector.load %arg6[%c0_10, %c0_11, %c0_12] : memref<2x32x192xf32, #tpu.memory_space<vmem>>, vector<1x32x192xf32>
    %11 = vector.shape_cast %10 : vector<1x32x192xf32> to vector<32x192xf32>
    %cst_13 = arith.constant dense<0.000000e+00> : vector<8x192xf32>
    %12 = tpu.matmul %9, %11, %cst_13 {dimension_numbers = #tpu.dot_dimension_numbers<[1], [0], [0], [1], [0, 0, 1, 1], [], []>} : vector<8x32xf32>, vector<32x192xf32>, vector<8x192xf32> -> vector<8x192xf32>
    %c0_14 = arith.constant 0 : index
    %c0_15 = arith.constant 0 : index
    %c0_16 = arith.constant 0 : index
    %13 = vector.load %arg7[%c0_14, %c0_15, %c0_16] : memref<2x1x192xf32, #tpu.memory_space<vmem>>, vector<1x1x192xf32>
    %14 = vector.shape_cast %13 : vector<1x1x192xf32> to vector<1x192xf32>
    %15 = vector.broadcast %14 : vector<1x192xf32> to vector<8x192xf32>
    %16 = arith.addf %12, %15 : vector<8x192xf32>
    %17 = vector.extract_strided_slice %16 {offsets = [0, 0], sizes = [8, 64], strides = [1, 1]} : vector<8x192xf32> to vector<8x64xf32>
    %18 = vector.extract_strided_slice %16 {offsets = [0, 64], sizes = [8, 64], strides = [1, 1]} : vector<8x192xf32> to vector<8x64xf32>
    %19 = vector.extract_strided_slice %16 {offsets = [0, 128], sizes = [8, 64], strides = [1, 1]} : vector<8x192xf32> to vector<8x64xf32>
    %20 = vector.extract_strided_slice %17 {offsets = [0, 0], sizes = [8, 32], strides = [1, 1]} : vector<8x64xf32> to vector<8x32xf32>
    %21 = vector.extract_strided_slice %18 {offsets = [0, 0], sizes = [8, 32], strides = [1, 1]} : vector<8x64xf32> to vector<8x32xf32>
    %22 = vector.extract_strided_slice %19 {offsets = [0, 0], sizes = [8, 32], strides = [1, 1]} : vector<8x64xf32> to vector<8x32xf32>
    %23 = tpu.transpose %21, [1, 0] : vector<8x32xf32> -> vector<32x8xf32>
    %cst_17 = arith.constant dense<0.000000e+00> : vector<8x8xf32>
    %24 = tpu.matmul %20, %23, %cst_17 {dimension_numbers = #tpu.dot_dimension_numbers<[1], [0], [0], [1], [0, 0, 1, 1], [], []>} : vector<8x32xf32>, vector<32x8xf32>, vector<8x8xf32> -> vector<8x8xf32>
    %cst_18 = arith.constant 0.176776692 : f32
    %25 = vector.broadcast %cst_18 : f32 to vector<8x8xf32>
    %26 = arith.mulf %24, %25 : vector<8x8xf32>
    %27 = arith.addf %26, %2 : vector<8x8xf32>
    %cst_19 = arith.constant dense<0xFF800000> : vector<8xf32>
    %28 = vector.multi_reduction <maximumf>, %27, %cst_19 [1] : vector<8x8xf32> to vector<8xf32>
    %29 = vector.shape_cast %28 : vector<8xf32> to vector<8x1xf32>
    %30 = vector.broadcast %29 : vector<8x1xf32> to vector<8x8xf32>
    %31 = arith.subf %27, %30 : vector<8x8xf32>
    %32 = math.exp %31 : vector<8x8xf32>
    %cst_20 = arith.constant dense<0.000000e+00> : vector<8xf32>
    %33 = vector.multi_reduction <add>, %32, %cst_20 [1] : vector<8x8xf32> to vector<8xf32>
    %34 = vector.shape_cast %33 : vector<8xf32> to vector<8x1xf32>
    %35 = tpu.reciprocal %34 : vector<8x1xf32> -> vector<8x1xf32>
    %36 = vector.broadcast %35 : vector<8x1xf32> to vector<8x8xf32>
    %37 = arith.mulf %32, %36 : vector<8x8xf32>
    %cst_21 = arith.constant dense<0.000000e+00> : vector<8x32xf32>
    %38 = tpu.matmul %37, %22, %cst_21 {dimension_numbers = #tpu.dot_dimension_numbers<[1], [0], [0], [1], [0, 0, 1, 1], [], []>} : vector<8x8xf32>, vector<8x32xf32>, vector<8x32xf32> -> vector<8x32xf32>
    %39 = vector.extract_strided_slice %17 {offsets = [0, 32], sizes = [8, 32], strides = [1, 1]} : vector<8x64xf32> to vector<8x32xf32>
    %40 = vector.extract_strided_slice %18 {offsets = [0, 32], sizes = [8, 32], strides = [1, 1]} : vector<8x64xf32> to vector<8x32xf32>
    %41 = vector.extract_strided_slice %19 {offsets = [0, 32], sizes = [8, 32], strides = [1, 1]} : vector<8x64xf32> to vector<8x32xf32>
    %42 = tpu.transpose %40, [1, 0] : vector<8x32xf32> -> vector<32x8xf32>
    %cst_22 = arith.constant dense<0.000000e+00> : vector<8x8xf32>
    %43 = tpu.matmul %39, %42, %cst_22 {dimension_numbers = #tpu.dot_dimension_numbers<[1], [0], [0], [1], [0, 0, 1, 1], [], []>} : vector<8x32xf32>, vector<32x8xf32>, vector<8x8xf32> -> vector<8x8xf32>
    %cst_23 = arith.constant 0.176776692 : f32
    %44 = vector.broadcast %cst_23 : f32 to vector<8x8xf32>
    %45 = arith.mulf %43, %44 : vector<8x8xf32>
    %46 = arith.addf %45, %2 : vector<8x8xf32>
    %cst_24 = arith.constant dense<0xFF800000> : vector<8xf32>
    %47 = vector.multi_reduction <maximumf>, %46, %cst_24 [1] : vector<8x8xf32> to vector<8xf32>
    %48 = vector.shape_cast %47 : vector<8xf32> to vector<8x1xf32>
    %49 = vector.broadcast %48 : vector<8x1xf32> to vector<8x8xf32>
    %50 = arith.subf %46, %49 : vector<8x8xf32>
    %51 = math.exp %50 : vector<8x8xf32>
    %cst_25 = arith.constant dense<0.000000e+00> : vector<8xf32>
    %52 = vector.multi_reduction <add>, %51, %cst_25 [1] : vector<8x8xf32> to vector<8xf32>
    %53 = vector.shape_cast %52 : vector<8xf32> to vector<8x1xf32>
    %54 = tpu.reciprocal %53 : vector<8x1xf32> -> vector<8x1xf32>
    %55 = vector.broadcast %54 : vector<8x1xf32> to vector<8x8xf32>
    %56 = arith.mulf %51, %55 : vector<8x8xf32>
    %cst_26 = arith.constant dense<0.000000e+00> : vector<8x32xf32>
    %57 = tpu.matmul %56, %41, %cst_26 {dimension_numbers = #tpu.dot_dimension_numbers<[1], [0], [0], [1], [0, 0, 1, 1], [], []>} : vector<8x8xf32>, vector<8x32xf32>, vector<8x32xf32> -> vector<8x32xf32>
    %58 = tpu.concatenate %37, %56 in 1 : vector<8x8xf32>, vector<8x8xf32> -> vector<8x16xf32>
    %c0_27 = arith.constant 0 : index
    %c0_28 = arith.constant 0 : index
    %c0_29 = arith.constant 0 : index
    %c0_30 = arith.constant 0 : index
    %59 = vector.load %arg21[%c0_27, %c0_28, %c0_29, %c0_30] : memref<2x1x8x16xf32, #tpu.memory_space<vmem>>, vector<1x1x8x16xf32>
    %60 = vector.shape_cast %59 : vector<1x1x8x16xf32> to vector<8x16xf32>
    %61 = vector.shape_cast %58 : vector<8x16xf32> to vector<1x1x8x16xf32>
    tpu.vector_store %arg21[%c0_27, %c0_28, %c0_29, %c0_30], %61 {strides = array<i32>} : memref<2x1x8x16xf32, #tpu.memory_space<vmem>>, vector<1x1x8x16xf32>,
    %62 = tpu.concatenate %38, %57 in 1 : vector<8x32xf32>, vector<8x32xf32> -> vector<8x64xf32>
    %c0_31 = arith.constant 0 : index
    %c0_32 = arith.constant 0 : index
    %c0_33 = arith.constant 0 : index
    %63 = vector.load %arg8[%c0_31, %c0_32, %c0_33] : memref<2x64x32xf32, #tpu.memory_space<vmem>>, vector<1x64x32xf32>
    %64 = vector.shape_cast %63 : vector<1x64x32xf32> to vector<64x32xf32>
    %cst_34 = arith.constant dense<0.000000e+00> : vector<8x32xf32>
    %65 = tpu.matmul %62, %64, %cst_34 {dimension_numbers = #tpu.dot_dimension_numbers<[1], [0], [0], [1], [0, 0, 1, 1], [], []>} : vector<8x64xf32>, vector<64x32xf32>, vector<8x32xf32> -> vector<8x32xf32>
    %c0_35 = arith.constant 0 : index
    %c0_36 = arith.constant 0 : index
    %c0_37 = arith.constant 0 : index
    %66 = vector.load %arg9[%c0_35, %c0_36, %c0_37] : memref<2x1x32xf32, #tpu.memory_space<vmem>>, vector<1x1x32xf32>
    %67 = vector.shape_cast %66 : vector<1x1x32xf32> to vector<1x32xf32>
    %68 = vector.broadcast %67 : vector<1x32xf32> to vector<8x32xf32>
    %69 = arith.addf %65, %68 : vector<8x32xf32>
    %70 = arith.addf %69, %9 : vector<8x32xf32>
    %c0_38 = arith.constant 0 : index
    %c0_39 = arith.constant 0 : index
    %c0_40 = arith.constant 0 : index
    %71 = vector.load %arg10[%c0_38, %c0_39, %c0_40] : memref<2x1x32xf32, #tpu.memory_space<vmem>>, vector<1x1x32xf32>
    %72 = vector.shape_cast %71 : vector<1x1x32xf32> to vector<1x32xf32>
    %c0_41 = arith.constant 0 : index
    %c0_42 = arith.constant 0 : index
    %c0_43 = arith.constant 0 : index
    %73 = vector.load %arg11[%c0_41, %c0_42, %c0_43] : memref<2x1x32xf32, #tpu.memory_space<vmem>>, vector<1x1x32xf32>
    %74 = vector.shape_cast %73 : vector<1x1x32xf32> to vector<1x32xf32>
    %cst_44 = arith.constant dense<0.000000e+00> : vector<8xf32>
    %75 = vector.multi_reduction <add>, %70, %cst_44 [1] : vector<8x32xf32> to vector<8xf32>
    %76 = vector.shape_cast %75 : vector<8xf32> to vector<8x1xf32>
    %cst_45 = arith.constant 3.200000e+01 : f32
    %77 = vector.broadcast %cst_45 : f32 to vector<8x1xf32>
    %78 = arith.divf %76, %77 : vector<8x1xf32>
    %79 = vector.broadcast %78 : vector<8x1xf32> to vector<8x32xf32>
    %80 = arith.subf %70, %79 : vector<8x32xf32>
    %81 = arith.mulf %80, %80 : vector<8x32xf32>
    %cst_46 = arith.constant dense<0.000000e+00> : vector<8xf32>
    %82 = vector.multi_reduction <add>, %81, %cst_46 [1] : vector<8x32xf32> to vector<8xf32>
    %83 = vector.shape_cast %82 : vector<8xf32> to vector<8x1xf32>
    %cst_47 = arith.constant 3.200000e+01 : f32
    %84 = vector.broadcast %cst_47 : f32 to vector<8x1xf32>
    %85 = arith.divf %83, %84 : vector<8x1xf32>
    %86 = vector.broadcast %78 : vector<8x1xf32> to vector<8x32xf32>
    %87 = arith.subf %70, %86 : vector<8x32xf32>
    %cst_48 = arith.constant 9.99999971E-10 : f32
    %88 = vector.broadcast %cst_48 : f32 to vector<8x1xf32>
    %89 = arith.addf %85, %88 : vector<8x1xf32>
    %90 = math.rsqrt %89 : vector<8x1xf32>
    %91 = vector.broadcast %90 : vector<8x1xf32> to vector<8x32xf32>
    %92 = arith.mulf %87, %91 : vector<8x32xf32>
    %93 = vector.broadcast %72 : vector<1x32xf32> to vector<8x32xf32>
    %94 = arith.mulf %92, %93 : vector<8x32xf32>
    %95 = vector.broadcast %74 : vector<1x32xf32> to vector<8x32xf32>
    %96 = arith.addf %94, %95 : vector<8x32xf32>
    %c0_49 = arith.constant 0 : index
    %c0_50 = arith.constant 0 : index
    %c0_51 = arith.constant 0 : index
    %97 = vector.load %arg12[%c0_49, %c0_50, %c0_51] : memref<2x32x64xf32, #tpu.memory_space<vmem>>, vector<1x32x64xf32>
    %98 = vector.shape_cast %97 : vector<1x32x64xf32> to vector<32x64xf32>
    %cst_52 = arith.constant dense<0.000000e+00> : vector<8x64xf32>
    %99 = tpu.matmul %96, %98, %cst_52 {dimension_numbers = #tpu.dot_dimension_numbers<[1], [0], [0], [1], [0, 0, 1, 1], [], []>} : vector<8x32xf32>, vector<32x64xf32>, vector<8x64xf32> -> vector<8x64xf32>
    %c0_53 = arith.constant 0 : index
    %c0_54 = arith.constant 0 : index
    %c0_55 = arith.constant 0 : index
    %100 = vector.load %arg13[%c0_53, %c0_54, %c0_55] : memref<2x1x64xf32, #tpu.memory_space<vmem>>, vector<1x1x64xf32>
    %101 = vector.shape_cast %100 : vector<1x1x64xf32> to vector<1x64xf32>
    %102 = vector.broadcast %101 : vector<1x64xf32> to vector<8x64xf32>
    %103 = arith.addf %99, %102 : vector<8x64xf32>
    %cst_56 = arith.constant 0.000000e+00 : f32
    %104 = vector.broadcast %cst_56 : f32 to vector<8x64xf32>
    %105 = arith.maximumf %103, %104 : vector<8x64xf32>
    %c0_57 = arith.constant 0 : index
    %c0_58 = arith.constant 0 : index
    %c0_59 = arith.constant 0 : index
    %106 = vector.load %arg14[%c0_57, %c0_58, %c0_59] : memref<2x64x32xf32, #tpu.memory_space<vmem>>, vector<1x64x32xf32>
    %107 = vector.shape_cast %106 : vector<1x64x32xf32> to vector<64x32xf32>
    %cst_60 = arith.constant dense<0.000000e+00> : vector<8x32xf32>
    %108 = tpu.matmul %105, %107, %cst_60 {dimension_numbers = #tpu.dot_dimension_numbers<[1], [0], [0], [1], [0, 0, 1, 1], [], []>} : vector<8x64xf32>, vector<64x32xf32>, vector<8x32xf32> -> vector<8x32xf32>
    %c0_61 = arith.constant 0 : index
    %c0_62 = arith.constant 0 : index
    %c0_63 = arith.constant 0 : index
    %109 = vector.load %arg15[%c0_61, %c0_62, %c0_63] : memref<2x1x32xf32, #tpu.memory_space<vmem>>, vector<1x1x32xf32>
    %110 = vector.shape_cast %109 : vector<1x1x32xf32> to vector<1x32xf32>
    %111 = vector.broadcast %110 : vector<1x32xf32> to vector<8x32xf32>
    %112 = arith.addf %108, %111 : vector<8x32xf32>
    %113 = arith.addf %112, %96 : vector<8x32xf32>
    %c0_64 = arith.constant 0 : index
    %c0_65 = arith.constant 0 : index
    %c0_66 = arith.constant 0 : index
    %114 = vector.load %arg16[%c0_64, %c0_65, %c0_66] : memref<2x1x32xf32, #tpu.memory_space<vmem>>, vector<1x1x32xf32>
    %115 = vector.shape_cast %114 : vector<1x1x32xf32> to vector<1x32xf32>
    %c0_67 = arith.constant 0 : index
    %c0_68 = arith.constant 0 : index
    %c0_69 = arith.constant 0 : index
    %116 = vector.load %arg17[%c0_67, %c0_68, %c0_69] : memref<2x1x32xf32, #tpu.memory_space<vmem>>, vector<1x1x32xf32>
    %117 = vector.shape_cast %116 : vector<1x1x32xf32> to vector<1x32xf32>
    %cst_70 = arith.constant dense<0.000000e+00> : vector<8xf32>
    %118 = vector.multi_reduction <add>, %113, %cst_70 [1] : vector<8x32xf32> to vector<8xf32>
    %119 = vector.shape_cast %118 : vector<8xf32> to vector<8x1xf32>
    %cst_71 = arith.constant 3.200000e+01 : f32
    %120 = vector.broadcast %cst_71 : f32 to vector<8x1xf32>
    %121 = arith.divf %119, %120 : vector<8x1xf32>
    %122 = vector.broadcast %121 : vector<8x1xf32> to vector<8x32xf32>
    %123 = arith.subf %113, %122 : vector<8x32xf32>
    %124 = arith.mulf %123, %123 : vector<8x32xf32>
    %cst_72 = arith.constant dense<0.000000e+00> : vector<8xf32>
    %125 = vector.multi_reduction <add>, %124, %cst_72 [1] : vector<8x32xf32> to vector<8xf32>
    %126 = vector.shape_cast %125 : vector<8xf32> to vector<8x1xf32>
    %cst_73 = arith.constant 3.200000e+01 : f32
    %127 = vector.broadcast %cst_73 : f32 to vector<8x1xf32>
    %128 = arith.divf %126, %127 : vector<8x1xf32>
    %129 = vector.broadcast %121 : vector<8x1xf32> to vector<8x32xf32>
    %130 = arith.subf %113, %129 : vector<8x32xf32>
    %cst_74 = arith.constant 9.99999971E-10 : f32
    %131 = vector.broadcast %cst_74 : f32 to vector<8x1xf32>
    %132 = arith.addf %128, %131 : vector<8x1xf32>
    %133 = math.rsqrt %132 : vector<8x1xf32>
    %134 = vector.broadcast %133 : vector<8x1xf32> to vector<8x32xf32>
    %135 = arith.mulf %130, %134 : vector<8x32xf32>
    %136 = vector.broadcast %115 : vector<1x32xf32> to vector<8x32xf32>
    %137 = arith.mulf %135, %136 : vector<8x32xf32>
    %138 = vector.broadcast %117 : vector<1x32xf32> to vector<8x32xf32>
    %139 = arith.addf %137, %138 : vector<8x32xf32>
    %c1 = arith.constant 1 : index
    %c0_75 = arith.constant 0 : index
    %c0_76 = arith.constant 0 : index
    %140 = vector.load %arg6[%c1, %c0_75, %c0_76] : memref<2x32x192xf32, #tpu.memory_space<vmem>>, vector<1x32x192xf32>
    %141 = vector.shape_cast %140 : vector<1x32x192xf32> to vector<32x192xf32>
    %cst_77 = arith.constant dense<0.000000e+00> : vector<8x192xf32>
    %142 = tpu.matmul %139, %141, %cst_77 {dimension_numbers = #tpu.dot_dimension_numbers<[1], [0], [0], [1], [0, 0, 1, 1], [], []>} : vector<8x32xf32>, vector<32x192xf32>, vector<8x192xf32> -> vector<8x192xf32>
    %c1_78 = arith.constant 1 : index
    %c0_79 = arith.constant 0 : index
    %c0_80 = arith.constant 0 : index
    %143 = vector.load %arg7[%c1_78, %c0_79, %c0_80] : memref<2x1x192xf32, #tpu.memory_space<vmem>>, vector<1x1x192xf32>
    %144 = vector.shape_cast %143 : vector<1x1x192xf32> to vector<1x192xf32>
    %145 = vector.broadcast %144 : vector<1x192xf32> to vector<8x192xf32>
    %146 = arith.addf %142, %145 : vector<8x192xf32>
    %147 = vector.extract_strided_slice %146 {offsets = [0, 0], sizes = [8, 64], strides = [1, 1]} : vector<8x192xf32> to vector<8x64xf32>
    %148 = vector.extract_strided_slice %146 {offsets = [0, 64], sizes = [8, 64], strides = [1, 1]} : vector<8x192xf32> to vector<8x64xf32>
    %149 = vector.extract_strided_slice %146 {offsets = [0, 128], sizes = [8, 64], strides = [1, 1]} : vector<8x192xf32> to vector<8x64xf32>
    %150 = vector.extract_strided_slice %147 {offsets = [0, 0], sizes = [8, 32], strides = [1, 1]} : vector<8x64xf32> to vector<8x32xf32>
    %151 = vector.extract_strided_slice %148 {offsets = [0, 0], sizes = [8, 32], strides = [1, 1]} : vector<8x64xf32> to vector<8x32xf32>
    %152 = vector.extract_strided_slice %149 {offsets = [0, 0], sizes = [8, 32], strides = [1, 1]} : vector<8x64xf32> to vector<8x32xf32>
    %153 = tpu.transpose %151, [1, 0] : vector<8x32xf32> -> vector<32x8xf32>
    %cst_81 = arith.constant dense<0.000000e+00> : vector<8x8xf32>
    %154 = tpu.matmul %150, %153, %cst_81 {dimension_numbers = #tpu.dot_dimension_numbers<[1], [0], [0], [1], [0, 0, 1, 1], [], []>} : vector<8x32xf32>, vector<32x8xf32>, vector<8x8xf32> -> vector<8x8xf32>
    %cst_82 = arith.constant 0.176776692 : f32
    %155 = vector.broadcast %cst_82 : f32 to vector<8x8xf32>
    %156 = arith.mulf %154, %155 : vector<8x8xf32>
    %157 = arith.addf %156, %2 : vector<8x8xf32>
    %cst_83 = arith.constant dense<0xFF800000> : vector<8xf32>
    %158 = vector.multi_reduction <maximumf>, %157, %cst_83 [1] : vector<8x8xf32> to vector<8xf32>
    %159 = vector.shape_cast %158 : vector<8xf32> to vector<8x1xf32>
    %160 = vector.broadcast %159 : vector<8x1xf32> to vector<8x8xf32>
    %161 = arith.subf %157, %160 : vector<8x8xf32>
    %162 = math.exp %161 : vector<8x8xf32>
    %cst_84 = arith.constant dense<0.000000e+00> : vector<8xf32>
    %163 = vector.multi_reduction <add>, %162, %cst_84 [1] : vector<8x8xf32> to vector<8xf32>
    %164 = vector.shape_cast %163 : vector<8xf32> to vector<8x1xf32>
    %165 = tpu.reciprocal %164 : vector<8x1xf32> -> vector<8x1xf32>
    %166 = vector.broadcast %165 : vector<8x1xf32> to vector<8x8xf32>
    %167 = arith.mulf %162, %166 : vector<8x8xf32>
    %cst_85 = arith.constant dense<0.000000e+00> : vector<8x32xf32>
    %168 = tpu.matmul %167, %152, %cst_85 {dimension_numbers = #tpu.dot_dimension_numbers<[1], [0], [0], [1], [0, 0, 1, 1], [], []>} : vector<8x8xf32>, vector<8x32xf32>, vector<8x32xf32> -> vector<8x32xf32>
    %169 = vector.extract_strided_slice %147 {offsets = [0, 32], sizes = [8, 32], strides = [1, 1]} : vector<8x64xf32> to vector<8x32xf32>
    %170 = vector.extract_strided_slice %148 {offsets = [0, 32], sizes = [8, 32], strides = [1, 1]} : vector<8x64xf32> to vector<8x32xf32>
    %171 = vector.extract_strided_slice %149 {offsets = [0, 32], sizes = [8, 32], strides = [1, 1]} : vector<8x64xf32> to vector<8x32xf32>
    %172 = tpu.transpose %170, [1, 0] : vector<8x32xf32> -> vector<32x8xf32>
    %cst_86 = arith.constant dense<0.000000e+00> : vector<8x8xf32>
    %173 = tpu.matmul %169, %172, %cst_86 {dimension_numbers = #tpu.dot_dimension_numbers<[1], [0], [0], [1], [0, 0, 1, 1], [], []>} : vector<8x32xf32>, vector<32x8xf32>, vector<8x8xf32> -> vector<8x8xf32>
    %cst_87 = arith.constant 0.176776692 : f32
    %174 = vector.broadcast %cst_87 : f32 to vector<8x8xf32>
    %175 = arith.mulf %173, %174 : vector<8x8xf32>
    %176 = arith.addf %175, %2 : vector<8x8xf32>
    %cst_88 = arith.constant dense<0xFF800000> : vector<8xf32>
    %177 = vector.multi_reduction <maximumf>, %176, %cst_88 [1] : vector<8x8xf32> to vector<8xf32>
    %178 = vector.shape_cast %177 : vector<8xf32> to vector<8x1xf32>
    %179 = vector.broadcast %178 : vector<8x1xf32> to vector<8x8xf32>
    %180 = arith.subf %176, %179 : vector<8x8xf32>
    %181 = math.exp %180 : vector<8x8xf32>
    %cst_89 = arith.constant dense<0.000000e+00> : vector<8xf32>
    %182 = vector.multi_reduction <add>, %181, %cst_89 [1] : vector<8x8xf32> to vector<8xf32>
    %183 = vector.shape_cast %182 : vector<8xf32> to vector<8x1xf32>
    %184 = tpu.reciprocal %183 : vector<8x1xf32> -> vector<8x1xf32>
    %185 = vector.broadcast %184 : vector<8x1xf32> to vector<8x8xf32>
    %186 = arith.mulf %181, %185 : vector<8x8xf32>
    %cst_90 = arith.constant dense<0.000000e+00> : vector<8x32xf32>
    %187 = tpu.matmul %186, %171, %cst_90 {dimension_numbers = #tpu.dot_dimension_numbers<[1], [0], [0], [1], [0, 0, 1, 1], [], []>} : vector<8x8xf32>, vector<8x32xf32>, vector<8x32xf32> -> vector<8x32xf32>
    %188 = tpu.concatenate %167, %186 in 1 : vector<8x8xf32>, vector<8x8xf32> -> vector<8x16xf32>
    %c1_91 = arith.constant 1 : index
    %c0_92 = arith.constant 0 : index
    %c0_93 = arith.constant 0 : index
    %c0_94 = arith.constant 0 : index
    %189 = vector.load %arg21[%c1_91, %c0_92, %c0_93, %c0_94] : memref<2x1x8x16xf32, #tpu.memory_space<vmem>>, vector<1x1x8x16xf32>
    %190 = vector.shape_cast %189 : vector<1x1x8x16xf32> to vector<8x16xf32>
    %191 = vector.shape_cast %188 : vector<8x16xf32> to vector<1x1x8x16xf32>
    tpu.vector_store %arg21[%c1_91, %c0_92, %c0_93, %c0_94], %191 {strides = array<i32>} : memref<2x1x8x16xf32, #tpu.memory_space<vmem>>, vector<1x1x8x16xf32>,
    %192 = tpu.concatenate %168, %187 in 1 : vector<8x32xf32>, vector<8x32xf32> -> vector<8x64xf32>
    %c1_95 = arith.constant 1 : index
    %c0_96 = arith.constant 0 : index
    %c0_97 = arith.constant 0 : index
    %193 = vector.load %arg8[%c1_95, %c0_96, %c0_97] : memref<2x64x32xf32, #tpu.memory_space<vmem>>, vector<1x64x32xf32>
    %194 = vector.shape_cast %193 : vector<1x64x32xf32> to vector<64x32xf32>
    %cst_98 = arith.constant dense<0.000000e+00> : vector<8x32xf32>
    %195 = tpu.matmul %192, %194, %cst_98 {dimension_numbers = #tpu.dot_dimension_numbers<[1], [0], [0], [1], [0, 0, 1, 1], [], []>} : vector<8x64xf32>, vector<64x32xf32>, vector<8x32xf32> -> vector<8x32xf32>
    %c1_99 = arith.constant 1 : index
    %c0_100 = arith.constant 0 : index
    %c0_101 = arith.constant 0 : index
    %196 = vector.load %arg9[%c1_99, %c0_100, %c0_101] : memref<2x1x32xf32, #tpu.memory_space<vmem>>, vector<1x1x32xf32>
    %197 = vector.shape_cast %196 : vector<1x1x32xf32> to vector<1x32xf32>
    %198 = vector.broadcast %197 : vector<1x32xf32> to vector<8x32xf32>
    %199 = arith.addf %195, %198 : vector<8x32xf32>
    %200 = arith.addf %199, %139 : vector<8x32xf32>
    %c1_102 = arith.constant 1 : index
    %c0_103 = arith.constant 0 : index
    %c0_104 = arith.constant 0 : index
    %201 = vector.load %arg10[%c1_102, %c0_103, %c0_104] : memref<2x1x32xf32, #tpu.memory_space<vmem>>, vector<1x1x32xf32>
    %202 = vector.shape_cast %201 : vector<1x1x32xf32> to vector<1x32xf32>
    %c1_105 = arith.constant 1 : index
    %c0_106 = arith.constant 0 : index
    %c0_107 = arith.constant 0 : index
    %203 = vector.load %arg11[%c1_105, %c0_106, %c0_107] : memref<2x1x32xf32, #tpu.memory_space<vmem>>, vector<1x1x32xf32>
    %204 = vector.shape_cast %203 : vector<1x1x32xf32> to vector<1x32xf32>
    %cst_108 = arith.constant dense<0.000000e+00> : vector<8xf32>
    %205 = vector.multi_reduction <add>, %200, %cst_108 [1] : vector<8x32xf32> to vector<8xf32>
    %206 = vector.shape_cast %205 : vector<8xf32> to vector<8x1xf32>
    %cst_109 = arith.constant 3.200000e+01 : f32
    %207 = vector.broadcast %cst_109 : f32 to vector<8x1xf32>
    %208 = arith.divf %206, %207 : vector<8x1xf32>
    %209 = vector.broadcast %208 : vector<8x1xf32> to vector<8x32xf32>
    %210 = arith.subf %200, %209 : vector<8x32xf32>
    %211 = arith.mulf %210, %210 : vector<8x32xf32>
    %cst_110 = arith.constant dense<0.000000e+00> : vector<8xf32>
    %212 = vector.multi_reduction <add>, %211, %cst_110 [1] : vector<8x32xf32> to vector<8xf32>
    %213 = vector.shape_cast %212 : vector<8xf32> to vector<8x1xf32>
    %cst_111 = arith.constant 3.200000e+01 : f32
    %214 = vector.broadcast %cst_111 : f32 to vector<8x1xf32>
    %215 = arith.divf %213, %214 : vector<8x1xf32>
    %216 = vector.broadcast %208 : vector<8x1xf32> to vector<8x32xf32>
    %217 = arith.subf %200, %216 : vector<8x32xf32>
    %cst_112 = arith.constant 9.99999971E-10 : f32
    %218 = vector.broadcast %cst_112 : f32 to vector<8x1xf32>
    %219 = arith.addf %215, %218 : vector<8x1xf32>
    %220 = math.rsqrt %219 : vector<8x1xf32>
    %221 = vector.broadcast %220 : vector<8x1xf32> to vector<8x32xf32>
    %222 = arith.mulf %217, %221 : vector<8x32xf32>
    %223 = vector.broadcast %202 : vector<1x32xf32> to vector<8x32xf32>
    %224 = arith.mulf %222, %223 : vector<8x32xf32>
    %225 = vector.broadcast %204 : vector<1x32xf32> to vector<8x32xf32>
    %226 = arith.addf %224, %225 : vector<8x32xf32>
    %c1_113 = arith.constant 1 : index
    %c0_114 = arith.constant 0 : index
    %c0_115 = arith.constant 0 : index
    %227 = vector.load %arg12[%c1_113, %c0_114, %c0_115] : memref<2x32x64xf32, #tpu.memory_space<vmem>>, vector<1x32x64xf32>
    %228 = vector.shape_cast %227 : vector<1x32x64xf32> to vector<32x64xf32>
    %cst_116 = arith.constant dense<0.000000e+00> : vector<8x64xf32>
    %229 = tpu.matmul %226, %228, %cst_116 {dimension_numbers = #tpu.dot_dimension_numbers<[1], [0], [0], [1], [0, 0, 1, 1], [], []>} : vector<8x32xf32>, vector<32x64xf32>, vector<8x64xf32> -> vector<8x64xf32>
    %c1_117 = arith.constant 1 : index
    %c0_118 = arith.constant 0 : index
    %c0_119 = arith.constant 0 : index
    %230 = vector.load %arg13[%c1_117, %c0_118, %c0_119] : memref<2x1x64xf32, #tpu.memory_space<vmem>>, vector<1x1x64xf32>
    %231 = vector.shape_cast %230 : vector<1x1x64xf32> to vector<1x64xf32>
    %232 = vector.broadcast %231 : vector<1x64xf32> to vector<8x64xf32>
    %233 = arith.addf %229, %232 : vector<8x64xf32>
    %cst_120 = arith.constant 0.000000e+00 : f32
    %234 = vector.broadcast %cst_120 : f32 to vector<8x64xf32>
    %235 = arith.maximumf %233, %234 : vector<8x64xf32>
    %c1_121 = arith.constant 1 : index
    %c0_122 = arith.constant 0 : index
    %c0_123 = arith.constant 0 : index
    %236 = vector.load %arg14[%c1_121, %c0_122, %c0_123] : memref<2x64x32xf32, #tpu.memory_space<vmem>>, vector<1x64x32xf32>
    %237 = vector.shape_cast %236 : vector<1x64x32xf32> to vector<64x32xf32>
    %cst_124 = arith.constant dense<0.000000e+00> : vector<8x32xf32>
    %238 = tpu.matmul %235, %237, %cst_124 {dimension_numbers = #tpu.dot_dimension_numbers<[1], [0], [0], [1], [0, 0, 1, 1], [], []>} : vector<8x64xf32>, vector<64x32xf32>, vector<8x32xf32> -> vector<8x32xf32>
    %c1_125 = arith.constant 1 : index
    %c0_126 = arith.constant 0 : index
    %c0_127 = arith.constant 0 : index
    %239 = vector.load %arg15[%c1_125, %c0_126, %c0_127] : memref<2x1x32xf32, #tpu.memory_space<vmem>>, vector<1x1x32xf32>
    %240 = vector.shape_cast %239 : vector<1x1x32xf32> to vector<1x32xf32>
    %241 = vector.broadcast %240 : vector<1x32xf32> to vector<8x32xf32>
    %242 = arith.addf %238, %241 : vector<8x32xf32>
    %243 = arith.addf %242, %226 : vector<8x32xf32>
    %c1_128 = arith.constant 1 : index
    %c0_129 = arith.constant 0 : index
    %c0_130 = arith.constant 0 : index
    %244 = vector.load %arg16[%c1_128, %c0_129, %c0_130] : memref<2x1x32xf32, #tpu.memory_space<vmem>>, vector<1x1x32xf32>
    %245 = vector.shape_cast %244 : vector<1x1x32xf32> to vector<1x32xf32>
    %c1_131 = arith.constant 1 : index
    %c0_132 = arith.constant 0 : index
    %c0_133 = arith.constant 0 : index
    %246 = vector.load %arg17[%c1_131, %c0_132, %c0_133] : memref<2x1x32xf32, #tpu.memory_space<vmem>>, vector<1x1x32xf32>
    %247 = vector.shape_cast %246 : vector<1x1x32xf32> to vector<1x32xf32>
    %cst_134 = arith.constant dense<0.000000e+00> : vector<8xf32>
    %248 = vector.multi_reduction <add>, %243, %cst_134 [1] : vector<8x32xf32> to vector<8xf32>
    %249 = vector.shape_cast %248 : vector<8xf32> to vector<8x1xf32>
    %cst_135 = arith.constant 3.200000e+01 : f32
    %250 = vector.broadcast %cst_135 : f32 to vector<8x1xf32>
    %251 = arith.divf %249, %250 : vector<8x1xf32>
    %252 = vector.broadcast %251 : vector<8x1xf32> to vector<8x32xf32>
    %253 = arith.subf %243, %252 : vector<8x32xf32>
    %254 = arith.mulf %253, %253 : vector<8x32xf32>
    %cst_136 = arith.constant dense<0.000000e+00> : vector<8xf32>
    %255 = vector.multi_reduction <add>, %254, %cst_136 [1] : vector<8x32xf32> to vector<8xf32>
    %256 = vector.shape_cast %255 : vector<8xf32> to vector<8x1xf32>
    %cst_137 = arith.constant 3.200000e+01 : f32
    %257 = vector.broadcast %cst_137 : f32 to vector<8x1xf32>
    %258 = arith.divf %256, %257 : vector<8x1xf32>
    %259 = vector.broadcast %251 : vector<8x1xf32> to vector<8x32xf32>
    %260 = arith.subf %243, %259 : vector<8x32xf32>
    %cst_138 = arith.constant 9.99999971E-10 : f32
    %261 = vector.broadcast %cst_138 : f32 to vector<8x1xf32>
    %262 = arith.addf %258, %261 : vector<8x1xf32>
    %263 = math.rsqrt %262 : vector<8x1xf32>
    %264 = vector.broadcast %263 : vector<8x1xf32> to vector<8x32xf32>
    %265 = arith.mulf %260, %264 : vector<8x32xf32>
    %266 = vector.broadcast %245 : vector<1x32xf32> to vector<8x32xf32>
    %267 = arith.mulf %265, %266 : vector<8x32xf32>
    %268 = vector.broadcast %247 : vector<1x32xf32> to vector<8x32xf32>
    %269 = arith.addf %267, %268 : vector<8x32xf32>
    %c0_139 = arith.constant 0 : index
    %c0_140 = arith.constant 0 : index
    %270 = vector.load %arg18[%c0_139, %c0_140] : memref<32x8xf32, #tpu.memory_space<vmem>>, vector<32x8xf32>
    %cst_141 = arith.constant dense<0.000000e+00> : vector<8x8xf32>
    %271 = tpu.matmul %269, %270, %cst_141 {dimension_numbers = #tpu.dot_dimension_numbers<[1], [0], [0], [1], [0, 0, 1, 1], [], []>} : vector<8x32xf32>, vector<32x8xf32>, vector<8x8xf32> -> vector<8x8xf32>
    %c0_142 = arith.constant 0 : index
    %c0_143 = arith.constant 0 : index
    %272 = vector.load %arg19[%c0_142, %c0_143] : memref<1x8xf32, #tpu.memory_space<vmem>>, vector<1x8xf32>
    %273 = vector.broadcast %272 : vector<1x8xf32> to vector<8x8xf32>
    %274 = arith.addf %271, %273 : vector<8x8xf32>
    %c0_144 = arith.constant 0 : index
    %c0_145 = arith.constant 0 : index
    %c0_146 = arith.constant 0 : index
    %275 = vector.load %arg20[%c0_144, %c0_145, %c0_146] : memref<1x8x8xf32, #tpu.memory_space<vmem>>, vector<1x8x8xf32>
    %276 = vector.shape_cast %275 : vector<1x8x8xf32> to vector<8x8xf32>
    %277 = vector.shape_cast %274 : vector<8x8xf32> to vector<1x8x8xf32>
    tpu.vector_store %arg20[%c0_144, %c0_145, %c0_146], %277 {strides = array<i32>} : memref<1x8x8xf32, #tpu.memory_space<vmem>>, vector<1x8x8xf32>,
    return
  }
  func.func @transform_0(%arg0: i32) -> (i32, i32, i32) {
    %c0_i32 = arith.constant 0 : i32
    %c0_i32_0 = arith.constant 0 : i32
    %c0_i32_1 = arith.constant 0 : i32
    return %arg0, %c0_i32, %c0_i32_0 : i32, i32, i32
  }
  func.func @transform_1(%arg0: i32) -> (i32, i32) {
    %c0_i32 = arith.constant 0 : i32
    %c0_i32_0 = arith.constant 0 : i32
    %c0_i32_1 = arith.constant 0 : i32
    return %c0_i32, %c0_i32_0 : i32, i32
  }
  func.func @transform_2(%arg0: i32) -> (i32, i32) {
    %c0_i32 = arith.constant 0 : i32
    %c0_i32_0 = arith.constant 0 : i32
    %c0_i32_1 = arith.constant 0 : i32
    return %c0_i32, %c0_i32_0 : i32, i32
  }
  func.func @transform_3(%arg0: i32) -> (i32, i32) {
    %c0_i32 = arith.constant 0 : i32
    %c0_i32_0 = arith.constant 0 : i32
    %c0_i32_1 = arith.constant 0 : i32
    return %c0_i32, %c0_i32_0 : i32, i32
  }
  func.func @transform_4(%arg0: i32) -> (i32, i32) {
    %c0_i32 = arith.constant 0 : i32
    %c0_i32_0 = arith.constant 0 : i32
    %c0_i32_1 = arith.constant 0 : i32
    return %c0_i32, %c0_i32_0 : i32, i32
  }
  func.func @transform_5(%arg0: i32) -> (i32, i32, i32) {
    %c0_i32 = arith.constant 0 : i32
    %c0_i32_0 = arith.constant 0 : i32
    %c0_i32_1 = arith.constant 0 : i32
    %c0_i32_2 = arith.constant 0 : i32
    return %c0_i32, %c0_i32_0, %c0_i32_1 : i32, i32, i32
  }
  func.func @transform_6(%arg0: i32) -> (i32, i32, i32) {
    %c0_i32 = arith.constant 0 : i32
    %c0_i32_0 = arith.constant 0 : i32
    %c0_i32_1 = arith.constant 0 : i32
    %c0_i32_2 = arith.constant 0 : i32
    return %c0_i32, %c0_i32_0, %c0_i32_1 : i32, i32, i32
  }
  func.func @transform_7(%arg0: i32) -> (i32, i32, i32) {
    %c0_i32 = arith.constant 0 : i32
    %c0_i32_0 = arith.constant 0 : i32
    %c0_i32_1 = arith.constant 0 : i32
    %c0_i32_2 = arith.constant 0 : i32
    return %c0_i32, %c0_i32_0, %c0_i32_1 : i32, i32, i32
  }
  func.func @transform_8(%arg0: i32) -> (i32, i32, i32) {
    %c0_i32 = arith.constant 0 : i32
    %c0_i32_0 = arith.constant 0 : i32
    %c0_i32_1 = arith.constant 0 : i32
    %c0_i32_2 = arith.constant 0 : i32
    return %c0_i32, %c0_i32_0, %c0_i32_1 : i32, i32, i32
  }
  func.func @transform_9(%arg0: i32) -> (i32, i32, i32) {
    %c0_i32 = arith.constant 0 : i32
    %c0_i32_0 = arith.constant 0 : i32
    %c0_i32_1 = arith.constant 0 : i32
    %c0_i32_2 = arith.constant 0 : i32
    return %c0_i32, %c0_i32_0, %c0_i32_1 : i32, i32, i32
  }
  func.func @transform_10(%arg0: i32) -> (i32, i32, i32) {
    %c0_i32 = arith.constant 0 : i32
    %c0_i32_0 = arith.constant 0 : i32
    %c0_i32_1 = arith.constant 0 : i32
    %c0_i32_2 = arith.constant 0 : i32
    return %c0_i32, %c0_i32_0, %c0_i32_1 : i32, i32, i32
  }
  func.func @transform_11(%arg0: i32) -> (i32, i32, i32) {
    %c0_i32 = arith.constant 0 : i32
    %c0_i32_0 = arith.constant 0 : i32
    %c0_i32_1 = arith.constant 0 : i32
    %c0_i32_2 = arith.constant 0 : i32
    return %c0_i32, %c0_i32_0, %c0_i32_1 : i32, i32, i32
  }
  func.func @transform_12(%arg0: i32) -> (i32, i32, i32) {
    %c0_i32 = arith.constant 0 : i32
    %c0_i32_0 = arith.constant 0 : i32
    %c0_i32_1 = arith.constant 0 : i32
    %c0_i32_2 = arith.constant 0 : i32
    return %c0_i32, %c0_i32_0, %c0_i32_1 : i32, i32, i32
  }
  func.func @transform_13(%arg0: i32) -> (i32, i32, i32) {
    %c0_i32 = arith.constant 0 : i32
    %c0_i32_0 = arith.constant 0 : i32
    %c0_i32_1 = arith.constant 0 : i32
    %c0_i32_2 = arith.constant 0 : i32
    return %c0_i32, %c0_i32_0, %c0_i32_1 : i32, i32, i32
  }
  func.func @transform_14(%arg0: i32) -> (i32, i32, i32) {
    %c0_i32 = arith.constant 0 : i32
    %c0_i32_0 = arith.constant 0 : i32
    %c0_i32_1 = arith.constant 0 : i32
    %c0_i32_2 = arith.constant 0 : i32
    return %c0_i32, %c0_i32_0, %c0_i32_1 : i32, i32, i32
  }
  func.func @transform_15(%arg0: i32) -> (i32, i32, i32) {
    %c0_i32 = arith.constant 0 : i32
    %c0_i32_0 = arith.constant 0 : i32
    %c0_i32_1 = arith.constant 0 : i32
    %c0_i32_2 = arith.constant 0 : i32
    return %c0_i32, %c0_i32_0, %c0_i32_1 : i32, i32, i32
  }
  func.func @transform_16(%arg0: i32) -> (i32, i32, i32) {
    %c0_i32 = arith.constant 0 : i32
    %c0_i32_0 = arith.constant 0 : i32
    %c0_i32_1 = arith.constant 0 : i32
    %c0_i32_2 = arith.constant 0 : i32
    return %c0_i32, %c0_i32_0, %c0_i32_1 : i32, i32, i32
  }
  func.func @transform_17(%arg0: i32) -> (i32, i32) {
    %c0_i32 = arith.constant 0 : i32
    %c0_i32_0 = arith.constant 0 : i32
    %c0_i32_1 = arith.constant 0 : i32
    return %c0_i32, %c0_i32_0 : i32, i32
  }
  func.func @transform_18(%arg0: i32) -> (i32, i32) {
    %c0_i32 = arith.constant 0 : i32
    %c0_i32_0 = arith.constant 0 : i32
    %c0_i32_1 = arith.constant 0 : i32
    return %c0_i32, %c0_i32_0 : i32, i32
  }
  func.func @transform_19(%arg0: i32) -> (i32, i32, i32) {
    %c0_i32 = arith.constant 0 : i32
    %c0_i32_0 = arith.constant 0 : i32
    %c0_i32_1 = arith.constant 0 : i32
    return %arg0, %c0_i32, %c0_i32_0 : i32, i32, i32
  }
  func.func @transform_20(%arg0: i32) -> (i32, i32, i32, i32) {
    %c0_i32 = arith.constant 0 : i32
    %c0_i32_0 = arith.constant 0 : i32
    %c0_i32_1 = arith.constant 0 : i32
    %c0_i32_2 = arith.constant 0 : i32
    return %c0_i32, %arg0, %c0_i32_0, %c0_i32_1 : i32, i32, i32, i32
  }
}

</mosaic_0001>

<bundles_post_ra>
// kernel: tpu_custom_call.1
= control target key start
LH: loop header
LB: loop body
LE: loop exit
PB: predicated region body
PF: predicated region fallthrough
CT: control target
= control target key end

     0   :  { %s3630_s0 = inlined_call_operand.vmem [shape: f32[2,8,16], index: 0, kind: input, shape index: {}]   ;;  %s3631_s1 = inlined_call_operand.vmem [shape: f32[8,8], index: 1, kind: input, shape index: {}]   ;;  %s3632_s2 = inlined_call_operand.vmem [shape: f32[8,32], index: 2, kind: input, shape index: {}]   ;;  %s3633_s3 = inlined_call_operand.vmem [shape: f32[16,32], index: 3, kind: input, shape index: {}]   ;;  %s3634_s4 = inlined_call_operand.vmem [shape: f32[1,32], index: 4, kind: input, shape index: {}]   ;;  %s3635_s5 = inlined_call_operand.vmem [shape: f32[2,32,192], index: 5, kind: input, shape index: {}]   ;;  %s3636_s6 = inlined_call_operand.vmem [shape: f32[2,1,192], index: 6, kind: input, shape index: {}]   ;;  %s3637_s7 = inlined_call_operand.vmem [shape: f32[2,64,32], index: 7, kind: input, shape index: {}]   ;;  %s3638_s8 = inlined_call_operand.vmem [shape: f32[2,1,32], index: 8, kind: input, shape index: {}]   ;;  %s3639_s9 = inlined_call_operand.vmem [shape: f32[2,1,32], index: 9, kind: input, shape index: {}]   ;;  %s3640_s10 = inlined_call_operand.vmem [shape: f32[2,1,32], index: 10, kind: input, shape index: {}]   ;;  %s3641_s11 = inlined_call_operand.vmem [shape: f32[2,32,64], index: 11, kind: input, shape index: {}]   ;;  %s3642_s12 = inlined_call_operand.vmem [shape: f32[2,1,64], index: 12, kind: input, shape index: {}]   ;;  %s3643_s13 = inlined_call_operand.vmem [shape: f32[2,64,32], index: 13, kind: input, shape index: {}]   ;;  %s3644_s14 = inlined_call_operand.vmem [shape: f32[2,1,32], index: 14, kind: input, shape index: {}]   ;;  %s3645_s15 = inlined_call_operand.vmem [shape: f32[2,1,32], index: 15, kind: input, shape index: {}]   ;;  %s3646_s16 = inlined_call_operand.vmem [shape: f32[2,1,32], index: 16, kind: input, shape index: {}]   ;;  %s3647_s17 = inlined_call_operand.vmem [shape: f32[32,8], index: 17, kind: input, shape index: {}]   ;;  %s3648_s18 = inlined_call_operand.vmem [shape: f32[1,8], index: 18, kind: input, shape index: {}]   ;;  %s3649_s19 = inlined_call_operand.hbm [shape: f32[2,8,8], index: 19, kind: output, shape index: {0}]   ;;  %s3650_s20 = inlined_call_operand.hbm [shape: f32[2,2,8,16], index: 20, kind: output, shape index: {1}]  }
   0x1   :  { %3664 = sst [smem:[#allocation12_spill]] %s3630_s0 }
   0x2   :  { %3665 = sst [smem:[#allocation13_spill]] %s3631_s1 }
   0x3   :  { %3666 = sst [smem:[#allocation14_spill]] %s3632_s2 }
   0x4   :  { %3667 = sst [smem:[#allocation15_spill]] %s3633_s3 }
   0x5   :  { %3668 = sst [smem:[#allocation16_spill]] %s3634_s4 }
   0x6   :  { %3669 = sst [smem:[#allocation17_spill]] %s3635_s5 }
   0x7   :  { %3670 = sst [smem:[#allocation18_spill]] %s3636_s6 }
   0x8   :  { %3671 = sst [smem:[#allocation19_spill]] %s3637_s7 }
   0x9   :  { %3672 = sst [smem:[#allocation20_spill]] %s3638_s8 }
   0xa   :  { %3673 = sst [smem:[#allocation21_spill]] %s3639_s9 }
   0xb   :  { %3674 = sst [smem:[#allocation22_spill]] %s3640_s10 }
   0xc   :  { %26 = vsyncpa [#allocation3], 0 }
   0xd   :  { %28 = vsyncpa [#allocation3 + $0x1], 0 }
   0xe   :  { %29 = vsyncpa [#allocation5], 0 }
   0xf   :  { %31 = vsyncpa [#allocation5 + $0x1], 0  ;;  %s3059_s1 = smov 0   ;;  %s3061_s22 = smov 0  }
  0x10   :  { %s3063_s23 = smov 0   ;;  %s3065_s24 = smov 0  }
  0x11 LB: > { %3675 = sst [smem:[#allocation8_spill]] %s2938_s23  ;;  %s3080_s2 = sadd.s32 4294967295, %s2942_s24   ;;  %s2942_s24 = sphi %s3065_s24, %s3699_s24   ;;  %s2938_s23 = sphi %s3063_s23, %s3701_s23   ;;  %s2934_s22 = sphi %s3061_s22, %s3703_s22   ;;  %s2930_s1 = sphi %s3059_s1, %s3702_s1  }
  0x12   : > { %s2462_s25 = sadd.s32 4294967294, %s2942_s24   ;;  %s3084_s3 = sadd.s32 1, %s2942_s24  }
  0x13   : > { %3676 = sst [smem:[#allocation9_spill]] %s3084_s3  ;;  %s448_s26 = sadd.s32 1, %s2938_s23 }
  0x14   : > { %s445_s27 = ssub.s32 %s2942_s24, %s3084_s3  ;;  %p458_p0 = scmp.ne.s32.totalorder %s2938_s23, %s2934_s22 }
  0x15   : > { %p446_p1 = scmp.eq.s32.totalorder %s445_s27, 0  ;;  %p459_p2 = scmp.eq.s32.totalorder %s3080_s2, 1 }
  0x16   : > { %p464_p3 = scmp.ne.s32.totalorder %s2934_s22, %s2930_s1  ;;  %p465_p4 = scmp.eq.s32.totalorder %s2462_s25, 1 }
  0x17   : > { %s3095_s28 = scalar_select %p446_p1, %s2938_s23, %s448_s26  }
  0x18   : > { %p3097_p5 = por %p459_p2, %p458_p0  ;;  %p3101_p6 = por %p465_p4, %p464_p3 }
  0x19   : > { %3677 = sst [smem:[#allocation10_spill]] %s3095_s28  ;;  %p2465_p7 = scmp.ge.s32.totalorder %s2942_s24, 1 }
  0x1a   : > { %s3679_s29 = scalar_select %p3101_p6, 1, 0 }
  0x1b   : > { %p570_p8 = scmp.lt.s32.totalorder %s2942_s24, 3 }
  0x1c   : > { %3680 = sst [smem:[#allocation11_spill]] %s3679_s29 }
  0x1d   : > { %p571_p9 = pnand %p2465_p7, %p570_p8 }
  0x1e   : > { %s3681_s21 = sld [smem:[#allocation15_spill]] (!%p571_p9)  ;;  %p632_p10 = scmp.lt.s32.totalorder (!%p571_p9), %s3080_s2, 1 }
  0x1f   : > { %574 = sbr.rel (%p571_p9) target bundleno = 5134 (0x140e), region = 96  ;;  %s3682_s5 = sld [smem:[#allocation17_spill]] (!%p571_p9) }
  0x20   : > { %s3684_s30 = sld [smem:[#allocation16_spill]] (!%p571_p9)  ;;  %s3657_s28 = smov (!%p571_p9), 96  }
  0x21   : > { %s3686_s6 = sld [smem:[#allocation18_spill]] (!%p571_p9)  ;;  %s3659_s27 = smov (!%p571_p9), 64  }
  0x22   : > { %s3660_s23 = smov (!%p571_p9), 32   ;;  %s3687_s0 = sld [smem:[#allocation13_spill]] (!%p571_p9) }
  0x23   : > { %s3688_s7 = sld [smem:[#allocation19_spill]] (!%p571_p9)  ;;  %s3692_s3 = smov (!%p571_p9), 32  }
  0x24   : > { %v639_v0 = vld [vmem:[%s3681_s21 + $0x8] sm:$0xff]  ;;  %v638_v1 = vld [vmem:[%s3681_s21] sm:$0xff]  ;;  %v2944_v2 = vmov 0.0   ;;  %vm2945_vm0 = vmmov 0   ;;  %s633_s25 = scalar_select %p632_p10, %s3080_s2, 1  ;;  %vm647_vm1 = vcmask 130048   ;;  %v733_v18 = vlaneseq }
  0x25   : > { %2620 = vmatprep.subr.mxu0 %v2944_v2  ;;  %2624 = vmatprep.mubr.msk.f32.mxu0 %vm2945_vm0, %v2944_v2  ;;  %v730_v3 = vld [vmem:[%s3682_s5 + $0x38] sm:$0xff]  ;;  %v729_v4 = vld [vmem:[%s3682_s5 + $0x30] sm:$0xff]  ;;  %v728_v5 = vld [vmem:[%s3682_s5 + $0x28] sm:$0xff]  ;;  %s3683_s21 = sld [smem:[#allocation12_spill]]  ;;  %vm743_vm2 = vcmask 261120   ;;  %vm897_vm3 = vcmask 64512  }
  0x26   : > { %2621 = vmatpush3.msra.mxu0 %v639_v0  ;;  %771 = vmatprep.subr.mxu1 %v730_v3  ;;  %s2468_s26 = sshll.u32 %s633_s25, 3  ;;  %v727_v7 = vld [vmem:[%s3682_s5 + $0x20] sm:$0xff]  ;;  %v726_v8 = vld [vmem:[%s3682_s5 + $0x18] sm:$0xff]  ;;  %v725_v9 = vld [vmem:[%s3682_s5 + $0x10] sm:$0xff]  ;;  %s3685_s25 = sld [smem:[#allocation14_spill]]  ;;  %v3164_v19 = vshrl.u32 %v733_v18, 7 }
  0x27   : > { %2622 = vmatprep.subr.mxu0 %v2944_v2  ;;  %772 = vmatpush1.msra.mxu1 %v729_v4  ;;  %v724_v10 = vld [vmem:[%s3682_s5 + $0x8] sm:$0xff]  ;;  %v723_v11 = vld [vmem:[%s3682_s5] sm:$0xff]  ;;  %vm1175_vm4 = vcmask 523264   ;;  %s3689_s8 = sld [smem:[#allocation20_spill]] }
  0x28   : > { %2623 = vmatpush3.msra.mxu0 %v638_v1  ;;  %773 = vmatprep.subr.mxu1 %v728_v5  ;;  %v2469_v12 = vld [vmem:[%s3684_s30] ss:$0 sm:$0xff]  ;;  %v735_v20 = vsub.s32 0, %v3164_v19  ;;  %v739_v25 = vsub.s32 1, %v3164_v19  ;;  %s3690_s9 = sld [smem:[#allocation21_spill]]  ;;  %s3694_s30 = smov 96  }
  0x29   : > { %811 = vmatprep.mubr.f32.mxu1 %v2944_v2  ;;  %2627 = vmatprep.subr.mxu0 %v2944_v2  ;;  %v731_v21 = vld [vmem:[%s3686_s6] sm:$0x3]  ;;  %v1167_v60 = vld [vmem:[%s3688_s7 + $0x38] sm:$0xff]  ;;  %v1166_v61 = vld [vmem:[%s3688_s7 + $0x30] sm:$0xff]  ;;  %s3691_s10 = sld [smem:[#allocation22_spill]] }
  0x2a   : > { %774 = vmatpush1.msra.mxu1 %v727_v7  ;;  %v736_v22 = vrot.slane %v731_v21, %v735_v20  ;;  %v740_v26 = vrot.slane %v731_v21, %v739_v25  ;;  %v3192_v33 = vld [vmem:[%s3687_s0] sm:$0xff]  ;;  %v1165_v62 = vld [vmem:[%s3688_s7 + $0x28] sm:$0xff]  ;;  %v1163_v0 = vld [vmem:[%s3688_s7 + $0x18] sm:$0xff] }
  0x2b   : > { %s635_s29 = scalar_lea.vmem %s3683_s21, %s2468_s26  ;;  %775 = vmatprep.subr.mxu1 %v726_v8  ;;  %v1164_v63 = vld [vmem:[%s3688_s7 + $0x20] sm:$0xff]  ;;  %v1162_v1 = vld [vmem:[%s3688_s7 + $0x10] sm:$0xff]  ;;  %v1161_v3 = vld [vmem:[%s3688_s7 + $0x8] sm:$0xff] }
  0x2c   : > { %v636_v6 = vld [vmem:[%s635_s29] sm:$0xff]  ;;  %776 = vmatpush1.msra.mxu1 %v725_v9 }
  0x2d   : > { %2625 = vmatmul.mubr.msk.f32.vlgmr.msra.gmra.mxu0 %vm647_vm1, %v636_v6  ;;  %777 = vmatprep.subr.mxu1 %v724_v10  ;;  %v721_v14 = vld [vmem:[%s3685_s25] sm:$0xff] }
  0x2e   : > { %2629 = vmatprep.mubr.msk.f32.mxu0 %vm2945_vm0, %v2944_v2  ;;  %778 = vmatpush1.msra.mxu1 %v723_v11  ;;  %v1160_v4 = vld [vmem:[%s3688_s7] sm:$0xff] }
  0x2f   : > { %2637 = vmatprep.subr.mxu1 %v2944_v2  ;;  %v2478_v11 = vld [vmem:[%s3689_s8] ss:$0 sm:$0xff] }
  0xed   : > { %v717_v13 = vpop.f32.mrf.mxu0 }
  0xee   : > { %v718_v15 = vadd.f32 %v2469_v12, %v717_v13 }
  0xef   : > { %v2626_v16 = vpop.f32.mrf.mxu0 }
  0xf0   : > { %v3158_v17 = vadd.f32 %v721_v14, %v718_v15 }
  0xf2   : > { %2471 = vmatmul.mubr.msk.f32.vlgmr.msra.gmra.mxu1 %vm743_vm2, %v3158_v17 }
  0xf3   : > { %2639 = vmatprep.mubr.msk.f32.mxu1 %vm2945_vm0, %v2944_v2 }
 0x1b2   : > { %v813_v23 = vpop.f32.mrf.mxu1 }
 0x1b3   : > { %v814_v24 = vadd.f32 %v813_v23, %v736_v22 }
 0x1b4   : > { %v815_v27 = vpop.f32.mrf.mxu1 }
 0x1b5   : > { %982 = vrot.lane.b32.xlu1 %v814_v24, %s3657_s28  ;;  %819 = vrot.lane.b32.xlu0 %v814_v24, %s3659_s27  ;;  %v816_v29 = vadd.f32 %v815_v27, %v740_v26  ;;  %v1283_v26 = vld [vmem:[%s3641_s11 + $0x18] sm:$0xff]  ;;  %v1282_v27 = vld [vmem:[%s3641_s11 + $0x10] sm:$0xff]  ;;  %s3662_s27 = smov 8  }
 0x1b9   : > { %984 = vrot.lane.b32.xlu0 %v814_v24, %s3660_s23 }
 0x227   : > { %v820_v28 = vpop.permute.xlu0 %819  ;;  %v983_v31 = vpop.permute.xlu1 %982 }
 0x228   : > { %2628 = vmatpush3.xpose.msk.msra.mxu0 %vm743_vm2, %v820_v28  ;;  %v1280_v28 = vld [vmem:[%s3641_s11] sm:$0xff] }
 0x229   : > { %2632 = vmatprep.subr.mxu0 %v2944_v2 }
 0x22b   : > { %2630 = vmatmul.mubr.msk.f32.vlgmr.msra.gmra.mxu0 %vm743_vm2, %v814_v24  ;;  %v985_v30 = vpop.permute.xlu0 %984 }
 0x22c   : > { %2633 = vmatpush3.msra.mxu0 %v816_v29  ;;  %2638 = vmatpush3.xpose.msk.msra.mxu1 %vm743_vm2, %v985_v30 }
 0x22d   : > { %2634 = vmatprep.mubr.msk.f32.mxu0 %vm2945_vm0, %v2944_v2  ;;  %2642 = vmatprep.subr.mxu0 %v2944_v2 }
 0x22e   : > { %2647 = vmatprep.subr.mxu1 %v2944_v2 }
 0x22f   : > { %2640 = vmatmul.mubr.msk.f32.vlgmr.msra.gmra.mxu1 %vm743_vm2, %v983_v31 }
 0x230   : > { %2663 = vmatprep.mubr.msk.f32.mxu1 %vm2945_vm0, %v2944_v2  ;;  %2648 = vmatpush3.msra.mxu1 %v1167_v60 }
 0x231   : > { %2649 = vmatprep.subr.mxu1 %v2944_v2 }
 0x232   : > { %2650 = vmatpush3.msra.mxu1 %v1166_v61 }
 0x233   : > { %2651 = vmatprep.subr.mxu1 %v2944_v2 }
 0x234   : > { %2652 = vmatpush3.msra.mxu1 %v1165_v62 }
 0x235   : > { %2653 = vmatprep.subr.mxu1 %v2944_v2 }
 0x236   : > { %2654 = vmatpush3.msra.mxu1 %v1164_v63 }
 0x237   : > { %2655 = vmatprep.subr.mxu1 %v2944_v2 }
 0x238   : > { %2656 = vmatpush3.msra.mxu1 %v1163_v0 }
 0x239   : > { %2657 = vmatprep.subr.mxu1 %v2944_v2 }
 0x23a   : > { %2658 = vmatpush3.msra.mxu1 %v1162_v1  ;;  %v2495_v1 = vld [vmem:[%s3682_s5 + $0x78] sm:$0xff] }
 0x23b   : > { %2659 = vmatprep.subr.mxu1 %v2944_v2 }
 0x23c   : > { %2660 = vmatpush3.msra.mxu1 %v1161_v3  ;;  %v2494_v3 = vld [vmem:[%s3682_s5 + $0x70] sm:$0xff] }
 0x23d   : > { %2661 = vmatprep.subr.mxu1 %v2944_v2 }
 0x23e   : > { %2662 = vmatpush3.msra.mxu1 %v1160_v4  ;;  %v2493_v4 = vld [vmem:[%s3682_s5 + $0x68] sm:$0xff] }
 0x23f   : > { %1532 = vmatprep.subr.mxu1 %v2495_v1  ;;  %v2505_v1 = vld [vmem:[%s3688_s7 + $0x40] sm:$0xff] }
 0x2eb   : > { %v891_v32 = vpop.f32.mrf.mxu0 }
 0x2ec   : > { %v895_v34 = vmul.f32 0.17677669, %v891_v32 }
 0x2ed   : > { %v2631_v35 = vpop.f32.mrf.mxu0 }
 0x2ee   : > { %v896_v36 = vadd.f32 %v895_v34, %v3192_v33  ;;  %v2480_v34 = vld [vmem:[%s3690_s9] ss:$0 sm:$0xff] }
 0x2ef   : > { %v1056_v37 = vpop.f32.mrf.mxu1 }
 0x2f0   : > { %v1060_v38 = vmul.f32 0.17677669, %v1056_v37  ;;  %v898_v39 = vsel %vm897_vm3, %v896_v36, -inf }
 0x2f1   : > { %v2641_v40 = vpop.f32.mrf.mxu1  ;;  %899 = vmax.xlane.f32.xlu1 %v898_v39  ;;  %v1372_v39 = vld [vmem:[%s3643_s13 + $0x38] sm:$0xff] }
 0x2f2   : > { %v1061_v41 = vadd.f32 %v1060_v38, %v3192_v33  ;;  %v1371_v40 = vld [vmem:[%s3643_s13 + $0x30] sm:$0xff] }
 0x2f4   : > { %v1062_v42 = vsel %vm897_vm3, %v1061_v41, -inf }
 0x2f5   : > { %1063 = vmax.xlane.f32.xlu0 %v1062_v42  ;;  %v1369_v42 = vld [vmem:[%s3643_s13 + $0x20] sm:$0xff] }
 0x37a   : > { %v900_v43 = vpop.xlane.xlu1 %899 }
 0x37b   : > { %v901_v44 = vsub.f32 %v896_v36, %v900_v43  ;;  %v2481_v36 = vld [vmem:[%s3691_s10] ss:$0 sm:$0xff]  ;;  %v1368_v43 = vld [vmem:[%s3643_s13 + $0x18] sm:$0xff] }
 0x37d   : > { %v902_v45 = vmul.f32 1.442695, %v901_v44  ;;  %v1367_v44 = vld [vmem:[%s3643_s13 + $0x10] sm:$0xff] }
 0x37e   : > { %v1064_v46 = vpop.xlane.xlu0 %1063 }
 0x37f   : > { %2828 = vpow2.f32 %v902_v45  ;;  %v1065_v47 = vsub.f32 %v1061_v41, %v1064_v46  ;;  %v1370_v41 = vld [vmem:[%s3643_s13 + $0x28] sm:$0xff]  ;;  %v1365_v46 = vld [vmem:[%s3643_s13] sm:$0xff] }
 0x380   : > { %v1366_v45 = vld [vmem:[%s3643_s13 + $0x8] sm:$0xff] }
 0x381   : > { %v1066_v48 = vmul.f32 1.442695, %v1065_v47  ;;  %v2482_v47 = vld [vmem:[%s3642_s12] ss:$0 sm:$0xff] }
 0x383   : > { %2830 = vpow2.f32 %v1066_v48 }
 0x38c   : > { %v2829_v49 = vpop.eup %2828 }
 0x38d   : > { %v904_v50 = vsel %vm897_vm3, %v2829_v49, 0.0 }
 0x38e   : > { %905 = vadd.xlane.f32.xlu0 %v904_v50 }
 0x390   : > { %v2831_v51 = vpop.eup %2830 }
 0x391   : > { %v1068_v52 = vsel %vm897_vm3, %v2831_v51, 0.0 }
 0x392   : > { %1069 = vadd.xlane.f32.xlu1 %v1068_v52  ;;  %v2484_v52 = vld [vmem:[%s3644_s14] ss:$0 sm:$0xff] }
 0x3a4   : > { %1074 = vrot.lane.b32.xlu0 %v816_v29, %s3657_s28  ;;  %s3693_s28 = smov 64  }
 0x417   : > { %v906_v53 = vpop.xlane.xlu0 %905 }
 0x418   : > { %2832 = vrcp.f32 %v906_v53 }
 0x41b   : > { %v1070_v54 = vpop.xlane.xlu1 %1069  ;;  %v1075_v57 = vpop.permute.xlu0 %1074 }
 0x41c   : > { %2834 = vrcp.f32 %v1070_v54 }
 0x425   : > { %v2833_v55 = vpop.eup %2832 }
 0x426   : > { %v3201_v56 = vmul.f32 %v2833_v55, %v2829_v49 }
 0x428   : > { %2635 = vmatmul.mubr.msk.f32.vlgmr.msra.gmra.mxu0 %vm897_vm3, %v3201_v56 }
 0x429   : > { %v2835_v58 = vpop.eup %2834  ;;  %2643 = vmatpush3.msra.mxu0 %v1075_v57  ;;  %2644 = vmatprep.mubr.msk.f32.mxu0 %vm2945_vm0, %v2944_v2 }
 0x42a   : > { %v3207_v59 = vmul.f32 %v2835_v58, %v2831_v51  ;;  %2666 = vmatprep.subr.mxu0 %v2944_v2 }
 0x42c   : > { %2645 = vmatmul.mubr.msk.f32.vlgmr.msra.gmra.mxu0 %vm897_vm3, %v3207_v59 }
 0x42d   : > { %2674 = vmatprep.mubr.msk.f32.mxu0 %vm2945_vm0, %v2944_v2  ;;  %2667 = vmatpush3.msra.mxu0 %v1283_v26 }
 0x42e   : > { %2668 = vmatprep.subr.mxu0 %v2944_v2 }
 0x42f   : > { %2669 = vmatpush3.msra.mxu0 %v1282_v27 }
 0x430   : > { %2670 = vmatprep.subr.mxu0 %v2944_v2 }
 0x4e8   : > { %v978_v5 = vpop.f32.mrf.mxu0 }
 0x4ea   : > { %v2636_v6 = vpop.f32.mrf.mxu0 }
 0x4eb   : > { %v2491_v6 = vld [vmem:[%s3682_s5 + $0x58] sm:$0xff] }
 0x4ec   : > { %v1146_v7 = vpop.f32.mrf.mxu0 }
 0x4ed   : > { %1156 = vrot.lane.b32.xlu1 %v1146_v7, %s3660_s23  ;;  %v2490_v7 = vld [vmem:[%s3682_s5 + $0x50] sm:$0xff]  ;;  %s3511_s23 = sand.u32 1, %s2934_s22  }
 0x4ee   : > { %v2646_v8 = vpop.f32.mrf.mxu0  ;;  %s2467_s21 = sshll.u32 %s3511_s23, 4 }
 0x4ef   : > { %v2489_v8 = vld [vmem:[%s3682_s5 + $0x48] sm:$0xff]  ;;  %s3516_s25 = scalar_lea.vmem [#allocation4], %s2467_s21 }
 0x55f   : > { %v1157_v9 = vpop.permute.xlu1 %1156 }
 0x560   : > { %v1159_v10 = vsel %vm743_vm2, %v978_v5, %v1157_v9  ;;  %v2492_v5 = vld [vmem:[%s3682_s5 + $0x60] sm:$0xff] }
 0x561   : > { %2664 = vmatmul.mubr.msk.f32.vlgmr.msra.gmra.mxu1 %vm1175_vm4, %v1159_v10  ;;  %v2488_v9 = vld [vmem:[%s3682_s5 + $0x40] sm:$0xff] }
 0x562   : > { %1572 = vmatprep.mubr.f32.mxu1 %v2944_v2  ;;  %1533 = vmatpush1.msra.mxu1 %v2494_v3 }
 0x563   : > { %1534 = vmatprep.subr.mxu1 %v2493_v4 }
 0x564   : > { %1535 = vmatpush1.msra.mxu1 %v2492_v5 }
 0x565   : > { %1536 = vmatprep.subr.mxu1 %v2491_v6 }
 0x566   : > { %1537 = vmatpush1.msra.mxu1 %v2490_v7 }
 0x567   : > { %1538 = vmatprep.subr.mxu1 %v2489_v8 }
 0x568   : > { %1539 = vmatpush1.msra.mxu1 %v2488_v9  ;;  %v2514_v9 = vld [vmem:[%s3689_s8 + $0x1] ss:$0 sm:$0xff] }
 0x569   : > { %2696 = vmatprep.subr.mxu1 %v2944_v2 }
 0x621   : > { %v1245_v12 = vpop.f32.mrf.mxu1 }
 0x622   : > { %v1246_v13 = vadd.f32 %v2478_v11, %v1245_v12 }
 0x623   : > { %v2665_v14 = vpop.f32.mrf.mxu1 }
 0x624   : > { %v1249_v15 = vadd.f32 %v1246_v13, %v3158_v17  ;;  %v1281_v17 = vld [vmem:[%s3641_s11 + $0x8] sm:$0xff]  ;;  %v2486_v14 = vld [vmem:[%s3645_s15] ss:$0 sm:$0xff] }
 0x625   : > { %2671 = vmatpush3.msra.mxu0 %v1281_v17 }
 0x626   : > { %v1252_v16 = vsel %vm743_vm2, %v1249_v15, 0.0  ;;  %2672 = vmatprep.subr.mxu0 %v2944_v2 }
 0x627   : > { %1253 = vadd.xlane.f32.xlu1 %v1252_v16  ;;  %2673 = vmatpush3.msra.mxu0 %v1280_v28  ;;  %v2487_v16 = vld [vmem:[%s3646_s16] ss:$0 sm:$0xff] }
 0x628   : > { %2677 = vmatprep.subr.mxu0 %v2944_v2 }
 0x6b0   : > { %v1254_v18 = vpop.xlane.xlu1 %1253 }
 0x6b1   : > { %v1256_v21 = vmul.f32 0.03125, %v1254_v18 }
 0x6b3   : > { %v1257_v22 = vsub.f32 %v1249_v15, %v1256_v21 }
 0x6b5   : > { %v1258_v23 = vmul.f32 %v1257_v22, %v1257_v22 }
 0x6b7   : > { %v1259_v24 = vsel %vm743_vm2, %v1258_v23, 0.0 }
 0x6b8   : > { %1260 = vadd.xlane.f32.xlu0 %v1259_v24 }
 0x741   : > { %v1261_v29 = vpop.xlane.xlu0 %1260 }
 0x742   : > { %v1262_v30 = vmul.f32 0.03125, %v1261_v29 }
 0x744   : > { %v1263_v31 = vadd.f32 1e-09, %v1262_v30 }
 0x746   : > { %2836 = vrsqrt.f32 %v1263_v31 }
 0x753   : > { %v2837_v32 = vpop.eup %2836 }
 0x754   : > { %v1265_v35 = vmul.f32 %v2837_v32, %v1257_v22  ;;  %v2496_v22 = vld [vmem:[%s3686_s6 + $0x2] sm:$0x3] }
 0x755   : > { %v1498_v23 = vrot.slane %v2496_v22, %v735_v20  ;;  %v1502_v24 = vrot.slane %v2496_v22, %v739_v25 }
 0x756   : > { %v1272_v37 = vmul.f32 %v2480_v34, %v1265_v35 }
 0x758   : > { %v1279_v38 = vadd.f32 %v2481_v36, %v1272_v37 }
 0x75a   : > { %2675 = vmatmul.mubr.msk.f32.vlgmr.msra.gmra.mxu0 %vm743_vm2, %v1279_v38 }
 0x75b   : > { %2678 = vmatpush3.msra.mxu0 %v1372_v39  ;;  %2693 = vmatprep.mubr.msk.f32.mxu0 %vm2945_vm0, %v2944_v2 }
 0x75c   : > { %2679 = vmatprep.subr.mxu0 %v2944_v2 }
 0x75d   : > { %2680 = vmatpush3.msra.mxu0 %v1371_v40 }
 0x75e   : > { %2681 = vmatprep.subr.mxu0 %v2944_v2 }
 0x75f   : > { %2682 = vmatpush3.msra.mxu0 %v1370_v41 }
 0x760   : > { %2683 = vmatprep.subr.mxu0 %v2944_v2 }
 0x761   : > { %2684 = vmatpush3.msra.mxu0 %v1369_v42 }
 0x762   : > { %2685 = vmatprep.subr.mxu0 %v2944_v2 }
 0x763   : > { %2686 = vmatpush3.msra.mxu0 %v1368_v43 }
 0x764   : > { %2687 = vmatprep.subr.mxu0 %v2944_v2 }
 0x765   : > { %2688 = vmatpush3.msra.mxu0 %v1367_v44 }
 0x766   : > { %2689 = vmatprep.subr.mxu0 %v2944_v2 }
 0x767   : > { %2690 = vmatpush3.msra.mxu0 %v1366_v45 }
 0x768   : > { %2691 = vmatprep.subr.mxu0 %v2944_v2 }
 0x769   : > { %2692 = vmatpush3.msra.mxu0 %v1365_v46 }
 0x76a   : > { %2701 = vmatprep.subr.mxu0 %v2944_v2 }
 0x81a   : > { %v1360_v48 = vpop.f32.mrf.mxu0 }
 0x81b   : > { %v1361_v49 = vadd.f32 %v2482_v47, %v1360_v48 }
 0x81c   : > { %v2676_v50 = vpop.f32.mrf.mxu0 }
 0x81d   : > { %v1364_v51 = vmax.f32 %v1361_v49, 0.0 }
 0x81f   : > { %2694 = vmatmul.mubr.msk.f32.vlgmr.msra.gmra.mxu0 %vm1175_vm4, %v1364_v51 }
 0x820   : > { %2703 = vmatprep.mubr.msk.f32.mxu0 %vm2945_vm0, %v2944_v2 }
 0x8df   : > { %v1449_v53 = vpop.f32.mrf.mxu0 }
 0x8e0   : > { %v1450_v54 = vadd.f32 %v2484_v52, %v1449_v53 }
 0x8e1   : > { %v2695_v55 = vpop.f32.mrf.mxu0 }
 0x8e2   : > { %v1453_v57 = vadd.f32 %v1450_v54, %v1279_v38 }
 0x8e4   : > { %v1456_v58 = vsel %vm743_vm2, %v1453_v57, 0.0 }
 0x8e5   : > { %1457 = vadd.xlane.f32.xlu0 %v1456_v58  ;;  %v2511_v58 = vld [vmem:[%s3688_s7 + $0x70] sm:$0xff] }
 0x96e   : > { %v1458_v60 = vpop.xlane.xlu0 %1457 }
 0x96f   : > { %v1459_v61 = vmul.f32 0.03125, %v1458_v60  ;;  %v2510_v60 = vld [vmem:[%s3688_s7 + $0x68] sm:$0xff] }
 0x971   : > { %v1460_v62 = vsub.f32 %v1453_v57, %v1459_v61  ;;  %v2512_v57 = vld [vmem:[%s3688_s7 + $0x78] sm:$0xff]  ;;  %v2509_v61 = vld [vmem:[%s3688_s7 + $0x60] sm:$0xff] }
 0x973   : > { %v1461_v63 = vmul.f32 %v1460_v62, %v1460_v62 }
 0x975   : > { %v1462_v0 = vsel %vm743_vm2, %v1461_v63, 0.0  ;;  %v2507_v63 = vld [vmem:[%s3688_s7 + $0x50] sm:$0xff] }
 0x976   : > { %1463 = vadd.xlane.f32.xlu1 %v1462_v0  ;;  %v2506_v0 = vld [vmem:[%s3688_s7 + $0x48] sm:$0xff] }
 0x9ff   : > { %v1464_v10 = vpop.xlane.xlu1 %1463 }
 0xa00   : > { %v1465_v11 = vmul.f32 0.03125, %v1464_v10 }
 0xa02   : > { %v1466_v12 = vadd.f32 1e-09, %v1465_v11 }
 0xa04   : > { %2838 = vrsqrt.f32 %v1466_v12 }
 0xa11   : > { %v2839_v13 = vpop.eup %2838 }
 0xa12   : > { %v1468_v15 = vmul.f32 %v2839_v13, %v1460_v62  ;;  %v2508_v62 = vld [vmem:[%s3688_s7 + $0x58] sm:$0xff] }
 0xa14   : > { %v1475_v18 = vmul.f32 %v2486_v14, %v1468_v15 }
 0xa16   : > { %v3354_v21 = vadd.f32 %v2487_v16, %v1475_v18 }
 0xa18   : > { %2497 = vmatmul.mubr.msk.f32.vlgmr.msra.gmra.mxu1 %vm743_vm2, %v3354_v21 }
 0xa19   : > { %2698 = vmatprep.mubr.msk.f32.mxu1 %vm2945_vm0, %v2944_v2 }
 0xad8   : > { %v1574_v26 = vpop.f32.mrf.mxu1 }
 0xad9   : > { %v1575_v27 = vadd.f32 %v1574_v26, %v1498_v23  ;;  %v2522_v26 = vld [vmem:[%s3641_s11 + $0x30] sm:$0xff] }
 0xada   : > { %v1576_v17 = vpop.f32.mrf.mxu1 }
 0xadb   : > { %v1577_v28 = vadd.f32 %v1576_v17, %v1502_v24  ;;  %1744 = vrot.lane.b32.xlu1 %v1575_v27, %s3692_s3  ;;  %1580 = vrot.lane.b32.xlu0 %v1575_v27, %s3693_s28  ;;  %v2523_v24 = vld [vmem:[%s3641_s11 + $0x38] sm:$0xff]  ;;  %s2950_s28 = smov [#allocation4]  }
 0xadd   : > { %2702 = vmatpush3.msra.mxu0 %v1577_v28 }
 0xade   : > { %2711 = vmatprep.subr.mxu0 %v2944_v2 }
 0xadf   : > { %1742 = vrot.lane.b32.xlu1 %v1575_v27, %s3694_s30 }
 0xb4d   : > { %v1581_v29 = vpop.permute.xlu0 %1580  ;;  %v1745_v30 = vpop.permute.xlu1 %1744 }
 0xb4e   : > { %2697 = vmatpush3.xpose.msk.msra.mxu1 %vm743_vm2, %v1581_v29 }
 0xb4f   : > { %2706 = vmatprep.subr.mxu1 %v2944_v2 }
 0xb51   : > { %2699 = vmatmul.mubr.msk.f32.vlgmr.msra.gmra.mxu1 %vm743_vm2, %v1575_v27  ;;  %v1743_v19 = vpop.permute.xlu1 %1742  ;;  %v2520_v27 = vld [vmem:[%s3641_s11 + $0x20] sm:$0xff] }
 0xb52   : > { %2707 = vmatpush3.xpose.msk.msra.mxu1 %vm743_vm2, %v1745_v30  ;;  %2708 = vmatprep.mubr.msk.f32.mxu1 %vm2945_vm0, %v2944_v2 }
 0xb53   : > { %2716 = vmatprep.subr.mxu1 %v2944_v2 }
 0xb55   : > { %2709 = vmatmul.mubr.msk.f32.vlgmr.msra.gmra.mxu1 %vm743_vm2, %v1743_v19  ;;  %v2518_v19 = vld [vmem:[%s3690_s9 + $0x1] ss:$0 sm:$0xff] }
 0xb56   : > { %2732 = vmatprep.mubr.msk.f32.mxu1 %vm2945_vm0, %v2944_v2  ;;  %2717 = vmatpush3.msra.mxu1 %v2512_v57 }
 0xb57   : > { %2718 = vmatprep.subr.mxu1 %v2944_v2 }
 0xb58   : > { %2719 = vmatpush3.msra.mxu1 %v2511_v58 }
 0xb59   : > { %2720 = vmatprep.subr.mxu1 %v2944_v2 }
 0xb5a   : > { %2721 = vmatpush3.msra.mxu1 %v2510_v60 }
 0xb5b   : > { %2722 = vmatprep.subr.mxu1 %v2944_v2 }
 0xb5c   : > { %2723 = vmatpush3.msra.mxu1 %v2509_v61 }
 0xb5d   : > { %2724 = vmatprep.subr.mxu1 %v2944_v2 }
 0xb5e   : > { %2725 = vmatpush3.msra.mxu1 %v2508_v62 }
 0xb5f   : > { %2726 = vmatprep.subr.mxu1 %v2944_v2 }
 0xb60   : > { %2727 = vmatpush3.msra.mxu1 %v2507_v63  ;;  %v2253_v63 = vld [vmem:[%s3647_s17 + $0x8] sm:$0xff] }
 0xb61   : > { %2728 = vmatprep.subr.mxu1 %v2944_v2 }
 0xb62   : > { %2729 = vmatpush3.msra.mxu1 %v2506_v0 }
 0xb63   : > { %2730 = vmatprep.subr.mxu1 %v2944_v2 }
 0xb64   : > { %2731 = vmatpush3.msra.mxu1 %v2505_v1 }
 0xb65   : > { %2765 = vmatprep.subr.mxu1 %v2944_v2 }
 0xc11   : > { %v1652_v20 = vpop.f32.mrf.mxu1 }
 0xc12   : > { %v1656_v25 = vmul.f32 0.17677669, %v1652_v20 }
 0xc13   : > { %v2700_v31 = vpop.f32.mrf.mxu1 }
 0xc14   : > { %v1657_v32 = vadd.f32 %v1656_v25, %v3192_v33  ;;  %v2519_v25 = vld [vmem:[%s3691_s10 + $0x1] ss:$0 sm:$0xff] }
 0xc15   : > { %v1816_v34 = vpop.f32.mrf.mxu1 }
 0xc16   : > { %v1820_v35 = vmul.f32 0.17677669, %v1816_v34  ;;  %v1658_v36 = vsel %vm897_vm3, %v1657_v32, -inf  ;;  %v2534_v34 = vld [vmem:[%s3643_s13 + $0x78] sm:$0xff] }
 0xc17   : > { %1659 = vmax.xlane.f32.xlu0 %v1658_v36  ;;  %v2710_v37 = vpop.f32.mrf.mxu1  ;;  %v2532_v36 = vld [vmem:[%s3643_s13 + $0x68] sm:$0xff] }
 0xc18   : > { %v1821_v38 = vadd.f32 %v1820_v35, %v3192_v33  ;;  %v2533_v35 = vld [vmem:[%s3643_s13 + $0x70] sm:$0xff]  ;;  %v2531_v37 = vld [vmem:[%s3643_s13 + $0x60] sm:$0xff] }
 0xc1a   : > { %v1822_v39 = vsel %vm897_vm3, %v1821_v38, -inf }
 0xc1b   : > { %1823 = vmax.xlane.f32.xlu1 %v1822_v39  ;;  %v2529_v39 = vld [vmem:[%s3643_s13 + $0x50] sm:$0xff] }
 0xc2c   : > { %1834 = vrot.lane.b32.xlu1 %v1577_v28, %s3694_s30  ;;  %s2368_s30 = sshll.u32 %s3516_s25, 4  ;;  %s3551_s30 = int_to_ptr.vmem [resolvable:$true] %s2368_s30 }
 0xc2d   : > { %s2852_s26 = scalar_lea.vmem %s3551_s30, 256 }
 0xc2e   : > { %p2853_p11 = scmp.ne.s32.totalorder %s3551_s30, %s2852_s26 }
 0xc30   : > { %p2854_p12 = pnand %p2853_p11, %p3097_p5 }
 0xc32   : > { %p2855_p13 = pneg %p2854_p12 }
 0xca0   : > { %v1660_v40 = vpop.xlane.xlu0 %1659 }
 0xca1   : > { %v1661_v41 = vsub.f32 %v1657_v32, %v1660_v40  ;;  %v2528_v40 = vld [vmem:[%s3643_s13 + $0x48] sm:$0xff] }
 0xca3   : > { %v1662_v42 = vmul.f32 1.442695, %v1661_v41  ;;  %v2527_v41 = vld [vmem:[%s3643_s13 + $0x40] sm:$0xff] }
 0xca4   : > { %v1824_v43 = vpop.xlane.xlu1 %1823 }
 0xca5   : > { %2840 = vpow2.f32 %v1662_v42  ;;  %v1825_v44 = vsub.f32 %v1821_v38, %v1824_v43  ;;  %v2530_v38 = vld [vmem:[%s3643_s13 + $0x58] sm:$0xff]  ;;  %v2525_v42 = vld [vmem:[%s3642_s12 + $0x1] ss:$0 sm:$0xff] }
 0xca7   : > { %v1826_v45 = vmul.f32 1.442695, %v1825_v44 }
 0xca8   : > { %v1835_v53 = vpop.permute.xlu1 %1834 }
 0xca9   : > { %2842 = vpow2.f32 %v1826_v45 }
 0xcb2   : > { %v2841_v46 = vpop.eup %2840 }
 0xcb3   : > { %v1664_v47 = vsel %vm897_vm3, %v2841_v46, 0.0 }
 0xcb4   : > { %1665 = vadd.xlane.f32.xlu0 %v1664_v47  ;;  %v2536_v47 = vld [vmem:[%s3644_s14 + $0x1] ss:$0 sm:$0xff] }
 0xcb6   : > { %v2843_v48 = vpop.eup %2842 }
 0xcb7   : > { %v1828_v33 = vsel %vm897_vm3, %v2843_v48, 0.0 }
 0xcb8   : > { %1829 = vadd.xlane.f32.xlu0 %v1828_v33 }
 0xd3d   : > { %v1666_v49 = vpop.xlane.xlu0 %1665 }
 0xd3e   : > { %2844 = vrcp.f32 %v1666_v49 }
 0xd41   : > { %v1830_v50 = vpop.xlane.xlu0 %1829 }
 0xd42   : > { %2846 = vrcp.f32 %v1830_v50 }
 0xd4b   : > { %v2845_v51 = vpop.eup %2844 }
 0xd4c   : > { %v3388_v52 = vmul.f32 %v2845_v51, %v2841_v46 }
 0xd4e   : > { %2704 = vmatmul.mubr.msk.f32.vlgmr.msra.gmra.mxu0 %vm897_vm3, %v3388_v52 }
 0xd4f   : > { %v2847_v54 = vpop.eup %2846  ;;  %2712 = vmatpush3.msra.mxu0 %v1835_v53  ;;  %2713 = vmatprep.mubr.msk.f32.mxu0 %vm2945_vm0, %v2944_v2 }
 0xd50   : > { %v3394_v55 = vmul.f32 %v2847_v54, %v2843_v48  ;;  %2735 = vmatprep.subr.mxu0 %v2944_v2 }
 0xd52   : > { %2714 = vmatmul.mubr.msk.f32.vlgmr.msra.gmra.mxu0 %vm897_vm3, %v3394_v55 }
 0xd53   : > { %2743 = vmatprep.mubr.msk.f32.mxu0 %vm2945_vm0, %v2944_v2  ;;  %2736 = vmatpush3.msra.mxu0 %v2523_v24 }
 0xd54   : > { %2737 = vmatprep.subr.mxu0 %v2944_v2 }
 0xd55   : > { %2738 = vmatpush3.msra.mxu0 %v2522_v26 }
 0xd56   : > { %2739 = vmatprep.subr.mxu0 %v2944_v2 }
 0xe0e   : > { %v1738_v3 = vpop.f32.mrf.mxu0 }
 0xe10   : > { %v2705_v4 = vpop.f32.mrf.mxu0 }
 0xe12   : > { %v1906_v5 = vpop.f32.mrf.mxu0 }
 0xe13   : > { %1917 = vrot.lane.b32.xlu0 %v1906_v5, %s3692_s3  ;;  %s3663_s3 = sshll.u32 %s3080_s2, 7 }
 0xe14   : > { %v2715_v6 = vpop.f32.mrf.mxu0 }
 0xe85   : > { %v1918_v7 = vpop.permute.xlu0 %1917 }
 0xe86   : > { %v1920_v8 = vsel %vm743_vm2, %v1738_v3, %v1918_v7 }
 0xe87   : > { %2733 = vmatmul.mubr.msk.f32.vlgmr.msra.gmra.mxu1 %vm1175_vm4, %v1920_v8  ;;  %v2541_v8 = vld [vmem:[%s3646_s16 + $0x1] ss:$0 sm:$0xff] }
 0xe88   : > { %2773 = vmatprep.mubr.msk.f32.mxu1 %vm2945_vm0, %v2944_v2 }
 0xf47   : > { %v2007_v10 = vpop.f32.mrf.mxu1 }
 0xf48   : > { %v2008_v11 = vadd.f32 %v2514_v9, %v2007_v10 }
 0xf49   : > { %v2734_v12 = vpop.f32.mrf.mxu1 }
 0xf4a   : > { %v2011_v13 = vadd.f32 %v2008_v11, %v3354_v21  ;;  %v2521_v21 = vld [vmem:[%s3641_s11 + $0x28] sm:$0xff] }
 0xf4b   : > { %2740 = vmatpush3.msra.mxu0 %v2521_v21 }
 0xf4c   : > { %v2016_v14 = vsel %vm743_vm2, %v2011_v13, 0.0  ;;  %2741 = vmatprep.subr.mxu0 %v2944_v2 }
 0xf4d   : > { %2017 = vadd.xlane.f32.xlu1 %v2016_v14  ;;  %2742 = vmatpush3.msra.mxu0 %v2520_v27 }
 0xf4e   : > { %2746 = vmatprep.subr.mxu0 %v2944_v2 }
 0xfd6   : > { %v2018_v15 = vpop.xlane.xlu1 %2017 }
 0xfd7   : > { %v2019_v16 = vmul.f32 0.03125, %v2018_v15 }
 0xfd9   : > { %v2020_v18 = vsub.f32 %v2011_v13, %v2019_v16 }
 0xfdb   : > { %v2021_v22 = vmul.f32 %v2020_v18, %v2020_v18 }
 0xfdd   : > { %v2022_v23 = vsel %vm743_vm2, %v2021_v22, 0.0 }
 0xfde   : > { %2023 = vadd.xlane.f32.xlu0 %v2022_v23 }
0x1067   : > { %v2024_v17 = vpop.xlane.xlu0 %2023 }
0x1068   : > { %v2025_v28 = vmul.f32 0.03125, %v2024_v17 }
0x106a   : > { %v2026_v29 = vadd.f32 1e-09, %v2025_v28 }
0x106c   : > { %2848 = vrsqrt.f32 %v2026_v29 }
0x1079   : > { %v2849_v30 = vpop.eup %2848 }
0x107a   : > { %v2028_v20 = vmul.f32 %v2849_v30, %v2020_v18 }
0x107c   : > { %v2035_v31 = vmul.f32 %v2518_v19, %v2028_v20 }
0x107e   : > { %v2042_v32 = vadd.f32 %v2519_v25, %v2035_v31 }
0x1080   : > { %2744 = vmatmul.mubr.msk.f32.vlgmr.msra.gmra.mxu0 %vm743_vm2, %v2042_v32 }
0x1081   : > { %2747 = vmatpush3.msra.mxu0 %v2534_v34  ;;  %2762 = vmatprep.mubr.msk.f32.mxu0 %vm2945_vm0, %v2944_v2 }
0x1082   : > { %2748 = vmatprep.subr.mxu0 %v2944_v2 }
0x1083   : > { %2749 = vmatpush3.msra.mxu0 %v2533_v35 }
0x1084   : > { %2750 = vmatprep.subr.mxu0 %v2944_v2 }
0x1085   : > { %2751 = vmatpush3.msra.mxu0 %v2532_v36 }
0x1086   : > { %2752 = vmatprep.subr.mxu0 %v2944_v2 }
0x1087   : > { %2753 = vmatpush3.msra.mxu0 %v2531_v37 }
0x1088   : > { %2754 = vmatprep.subr.mxu0 %v2944_v2 }
0x1089   : > { %2755 = vmatpush3.msra.mxu0 %v2530_v38 }
0x108a   : > { %2756 = vmatprep.subr.mxu0 %v2944_v2 }
0x108b   : > { %2757 = vmatpush3.msra.mxu0 %v2529_v39 }
0x108c   : > { %2758 = vmatprep.subr.mxu0 %v2944_v2 }
0x108d   : > { %2759 = vmatpush3.msra.mxu0 %v2528_v40 }
0x108e   : > { %2760 = vmatprep.subr.mxu0 %v2944_v2 }
0x108f   : > { %2761 = vmatpush3.msra.mxu0 %v2527_v41 }
0x1140   : > { %v2125_v43 = vpop.f32.mrf.mxu0 }
0x1141   : > { %v2126_v44 = vadd.f32 %v2525_v42, %v2125_v43 }
0x1142   : > { %v2745_v45 = vpop.f32.mrf.mxu0 }
0x1143   : > { %v2129_v46 = vmax.f32 %v2126_v44, 0.0 }
0x1145   : > { %2763 = vmatmul.mubr.msk.f32.vlgmr.msra.gmra.mxu0 %vm1175_vm4, %v2129_v46 }
0x1205   : > { %v2216_v48 = vpop.f32.mrf.mxu0 }
0x1206   : > { %v2217_v33 = vadd.f32 %v2536_v47, %v2216_v48 }
0x1207   : > { %v2764_v49 = vpop.f32.mrf.mxu0 }
0x1208   : > { %v2220_v50 = vadd.f32 %v2217_v33, %v2042_v32 }
0x120a   : > { %v2225_v51 = vsel %vm743_vm2, %v2220_v50, 0.0 }
0x120b   : > { %2226 = vadd.xlane.f32.xlu1 %v2225_v51 }
0x121c   : > { %1150 = vrot.lane.b32.xlu1 %v3207_v59, %s3662_s27  ;;  %v2255_v59 = vld [vmem:[%s3647_s17 + $0x18] sm:$0xff] }
0x121d   : > { %2766 = vmatpush3.msra.mxu1 %v2255_v59 }
0x121e   : > { %2767 = vmatprep.subr.mxu1 %v2944_v2 }
0x1294   : > { %v2227_v53 = vpop.xlane.xlu1 %2226 }
0x1295   : > { %v2228_v54 = vmul.f32 0.03125, %v2227_v53 }
0x1297   : > { %v2229_v57 = vsub.f32 %v2220_v50, %v2228_v54 }
0x1298   : > { %v1151_v58 = vpop.permute.xlu1 %1150 }
0x1299   : > { %v1153_v60 = vsel %vm897_vm3, %v3201_v56, %v1151_v58  ;;  %v2230_v61 = vmul.f32 %v2229_v57, %v2229_v57  ;;  %v2254_v56 = vld [vmem:[%s3647_s17 + $0x10] sm:$0xff] }
0x129a   : > { %1154 = vst.msk [vmem:[%s3516_s25] sm:$0xff] %vm647_vm1, %v1153_v60  ;;  %2768 = vmatpush3.msra.mxu1 %v2254_v56 }
0x129b   : > { %v2231_v62 = vsel %vm743_vm2, %v2230_v61, 0.0  ;;  %2769 = vmatprep.subr.mxu1 %v2944_v2 }
0x129c   : > { %2232 = vadd.xlane.f32.xlu0 %v2231_v62  ;;  %2770 = vmatpush3.msra.mxu1 %v2253_v63 }
0x129d   : > { %2771 = vmatprep.subr.mxu1 %v2944_v2  ;;  %v2540_v2 = vld [vmem:[%s3645_s15 + $0x1] ss:$0 sm:$0xff] }
0x12b2   : > { %1910 = vrot.lane.b32.xlu0 %v3394_v55, %s3662_s27  ;;  %v2252_v55 = vld [vmem:[%s3647_s17] sm:$0xff]  ;;  %s3558_s27 = scalar_lea.hbm %s3650_s20, %s3663_s3 }
0x12b3   : > { %2772 = vmatpush3.msra.mxu1 %v2252_v55 }
0x1325   : > { %v2233_v0 = vpop.xlane.xlu0 %2232 }
0x1326   : > { %v2234_v1 = vmul.f32 0.03125, %v2233_v0 }
0x1328   : > { %v2235_v3 = vadd.f32 1e-09, %v2234_v1 }
0x1329   : > { %v1911_v4 = vpop.permute.xlu0 %1910 }
0x132a   : > { %2850 = vrsqrt.f32 %v2235_v3  ;;  %v1913_v5 = vsel %vm897_vm3, %v3388_v52, %v1911_v4 }
0x132b   : > { %2504 = vst.msk [vmem:[%s3516_s25 + $0x8] sm:$0xff] %vm647_vm1, %v1913_v5  ;;  %s2856_s25 = sshll.u32 %s2950_s28, 4  ;;  %s2857_s25 = int_to_ptr.vmem [resolvable:$false] %s2856_s25 }
0x132c   : > { %s2858_s5 = scalar_lea.vmem %s2857_s25, 512  ;;  %p2859_p0 = scmp.lt.s32.totalorder %s3551_s30, %s2857_s25 }
0x132d   : > { %p2860_p1 = scmp.lt.s32.totalorder %s2858_s5, %s2852_s26 }
0x132f   : > { %p2861_p2 = por %p2860_p1, %p2859_p0 }
0x1331   : > { %p2862_p3 = pnand %p2861_p2, %p2855_p13 }
0x1337   : > { %v2851_v6 = vpop.eup %2850 }
0x1338   : > { %v2237_v7 = vmul.f32 %v2851_v6, %v2229_v57 }
0x133a   : > { %v2244_v9 = vmul.f32 %v2540_v2, %v2237_v7 }
0x133c   : > { %v2251_v10 = vadd.f32 %v2541_v8, %v2244_v9 }
0x133e   : > { %2774 = vmatmul.mubr.msk.f32.vlgmr.msra.gmra.mxu1 %vm743_vm2, %v2251_v10 }
0x133f   : > { %2865 = shalt.err (!%p2862_p3)
}
0x1340   : > { %s2866_s0 = scalar_lea.hbm %s3558_s27, 256  ;;  %s2870_s28 = scalar_lea.hbm %s3650_s20, 512 }
0x1341   : > { %p2867_p4 = scmp.ne.s32.totalorder %s3558_s27, %s2866_s0  ;;  %p2871_p9 = scmp.lt.s32.totalorder %s3558_s27, %s3650_s20 }
0x1342   : > { %p2872_p10 = scmp.lt.s32.totalorder %s2870_s28, %s2866_s0 }
0x1343   : > { %p2868_p7 = pnand %p2867_p4, %p3097_p5 }
0x1344   : > { %p2873_p11 = por %p2872_p10, %p2871_p9 }
0x1345   : > { %p2869_p8 = pneg %p2868_p7 }
0x1347   : > { %p2874_p12 = pnand %p2873_p11, %p2869_p8 }
0x1349   : > { %2877 = shalt.err (!%p2874_p12)
}
0x134a   : > { %s2951_s5 = smov 128   ;;  %s2952_s26 = smov 256   ;;  %v2542_v52 = vld [vmem:[%s3648_s18] ss:$0 sm:$0xff] }
0x134b   : > { %s3695_s3 = smov 8   ;;  %s3696_s25 = scalar_lea.sflag [#allocation5], %s3511_s23 }
0x134c   : > { %2777 = dma.vmem_to_hbm [thread:$0]  (%p3097_p5), %s3551_s30, 256, %s3558_s27, %s3696_s25, %s2951_s5, %s2952_s26, %s3695_s3  }
0x134d   : > { %s2466_s6 = sshll.u32 %s3511_s23, 3  ;;  %s3697_s7 = sshll.u32 %s3080_s2, 7 }
0x134e   : > { %s624_s21 = scalar_lea.vmem [#allocation2], %s2466_s6  ;;  %s3593_s10 = scalar_lea.hbm %s3649_s19, %s3697_s7 }
0x134f   : > { %s2356_s28 = sshll.u32 %s624_s21, 4  ;;  %s2338_s30 = scalar_lea.sflag [#allocation3], %s3511_s23  ;;  %s2357_s28 = int_to_ptr.vmem [resolvable:$true] %s2356_s28 }
0x1350   : > { %s2878_s27 = scalar_lea.vmem %s2357_s28, 128  ;;  %s2953_s5 = smov [#allocation2]  }
0x1351   : > { %p2879_p13 = scmp.ne.s32.totalorder %s2357_s28, %s2878_s27  ;;  %s2882_s26 = sshll.u32 %s2953_s5, 4  ;;  %s2883_s26 = int_to_ptr.vmem [resolvable:$false] %s2882_s26 }
0x1352   : > { %s2884_s3 = scalar_lea.vmem %s2883_s26, 256  ;;  %p2885_p2 = scmp.lt.s32.totalorder %s2357_s28, %s2883_s26 }
0x1353   : > { %p2880_p0 = pnand %p2879_p13, %p3097_p5  ;;  %p2886_p3 = scmp.lt.s32.totalorder %s2884_s3, %s2878_s27 }
0x1355   : > { %p2881_p1 = pneg %p2880_p0  ;;  %p2887_p4 = por %p2886_p3, %p2885_p2 }
0x1357   : > { %p2888_p7 = pnand %p2887_p4, %p2881_p1 }
0x13fe   : > { %v2332_v11 = vpop.f32.mrf.mxu1 }
0x13ff   : > { %v2333_v12 = vadd.f32 %v2542_v52, %v2332_v11 }
0x1400   : > { %v2775_v13 = vpop.f32.mrf.mxu1 }
0x1401   : > { %2336 = vst.msk [vmem:[%s624_s21] sm:$0xff] %vm897_vm3, %v2333_v12 }
0x1402   : > { %2891 = shalt.err (!%p2888_p7)
}
0x1403   : > { %s2892_s7 = scalar_lea.hbm %s3593_s10, 128  ;;  %s2896_s2 = scalar_lea.hbm %s3649_s19, 256 }
0x1404   : > { %p2893_p8 = scmp.ne.s32.totalorder %s3593_s10, %s2892_s7  ;;  %p2897_p11 = scmp.lt.s32.totalorder %s3593_s10, %s3649_s19 }
0x1405   : > { %p2898_p12 = scmp.lt.s32.totalorder %s2896_s2, %s2892_s7 }
0x1406   : > { %p2894_p9 = pnand %p2893_p8, %p3097_p5 }
0x1407   : > { %p2899_p13 = por %p2898_p12, %p2897_p11 }
0x1408   : > { %p2895_p10 = pneg %p2894_p9 }
0x140a   : > { %p2900_p0 = pnand %p2899_p13, %p2895_p10 }
0x140c   : > { %2903 = shalt.err (!%p2900_p0)
}
0x140d   : > { %2776 = dma.vmem_to_hbm [thread:$0]  (%p3097_p5), %s2357_s28, 128, %s3593_s10, %s2338_s30  }
0x140e PF: > { %p2787_p1 = scmp.ge.s32.totalorder %s2942_s24, 2  ;;  %s2383_s29 = sand.u32 1, %s2930_s1  }
0x140f   : > { %s2384_s0 = scalar_lea.sflag [#allocation3], %s2383_s29 }
0x1410   : > { %p2781_p2 = pnand %p2787_p1, %p3101_p6 }
0x1412   : > { %p2782_p3 = pneg %p2781_p2 }
0x1414   : > { %2921 = dma.done.wait (%p2782_p3), %s2384_s0, 128  }
0x1415   : > { %2923 = vsyncadd (%p2782_p3), %s2384_s0, 4294967168  ;;  %s2393_s21 = scalar_lea.sflag [#allocation5], %s2383_s29 }
0x1416   : > { %2925 = dma.done.wait (%p2782_p3), %s2393_s21, 256  }
0x1417   : > { %2927 = vsyncadd (%p2782_p3), %s2393_s21, 4294967040  ;;  %s3699_s24 = sld [smem:[#allocation9_spill]]  ;;  %s3702_s1 = smov %s2934_s22 }
0x1418   : > { %s3700_s4 = sld [smem:[#allocation8_spill]] }
0x1419   : > { %s3701_s23 = sld [smem:[#allocation10_spill]] }
0x141d   : > { %p34_p5 = scmp.ge.s32.totalorder %s3699_s24, 4  }
0x141e   : > { %s3703_s22 = smov %s3700_s4 }
0x141f   :  { %36 = sbr.rel (!%p34_p5) target bundleno = 17 (0x11), region = 161 }
0x1424   :  { %2398 = vsyncpa [#allocation3], 1 }
0x1425   :  { %2400 = vsyncpa [#allocation3 + $0x1], 1 }
0x1426   :  { %2401 = vsyncpa [#allocation5], 1 }
0x1427   :  { %2403 = vsyncpa [#allocation5 + $0x1], 1 }

</bundles_post_ra>
